<compile_context>
chip_gen: v7x
topology: tpu7x:2x2x1
jax: 0.10.0
libtpu: 0.0.40
codegen_flags: <defaults>
</compile_context>

<pallas_src>
import functools

import jax
import jax.numpy as jnp
from jax.experimental import pallas as pl
from jax.experimental.pallas import tpu as pltpu

EPS = 1e-5  # PyTorch GroupNorm default eps

# Flip to jnp.bfloat16 on v6e/v7x to halve MXU operand traffic (accumulation
# stays f32); f32 keeps one exact path vs. the Precision.HIGHEST reference.
MXU_IN_DTYPE = jnp.float32


# ----------------------------- in-kernel helpers ----------------------------

def _gn_silu(a, g, b):
    """GroupNorm(num_groups=1) over the whole (C, HW) tile + SiLU.

    Reductions are done on the MXU (dot with a ones vector) so the XLU stays
    free for the conv-tap rolls.  Affine is fused: y = a*scale + shift.
    Single-pass variance (E[x^2] - mean^2) is fine at the 2e-2 tolerance.
    """
    C, HW = a.shape
    ones = jnp.ones((HW, 1), jnp.float32)
    s_c = jnp.dot(a, ones, preferred_element_type=jnp.float32)        # (C,1)
    ss_c = jnp.dot(a * a, ones, preferred_element_type=jnp.float32)   # (C,1)
    n = float(C * HW)
    mean = jnp.sum(s_c, keepdims=True) / n                            # (1,1)
    var = jnp.sum(ss_c, keepdims=True) / n - mean * mean              # (1,1)
    scale = jax.lax.rsqrt(var + EPS) * g                              # (C,1)
    shift = b - mean * scale                                          # (C,1)
    y = a * scale + shift
    return y * jax.nn.sigmoid(y)


def _write_taps(a, mask_ref, stk_ref, col0, H, W):
    """Write the 9 shifted/masked images of `a` into the stacked conv operand.

    a: (C, HW) activation (row-major pixels on lanes) for ONE sample.
    For tap = ky*3+kx (dy = ky-1, dx = kx-1):
      stk[tap*C + c, col0 + y*W + x] = a[c, (y+dy)*W + (x+dx)]  (0 outside)
    Shifts are pltpu.roll (XLU); the zero-padding is one VPU multiply with a
    precomputed 0/1 mask (mask_ref[tap], shape (1, HW)); the center tap needs
    no mask.  Nothing is materialized through HBM.
    """
    C, HW = a.shape
    for tap in range(9):
        dy, dx = tap // 3 - 1, tap % 3 - 1
        d = dy * W + dx
        img = a if d == 0 else pltpu.roll(a, (-d) % HW, 1)
        if tap != 4:  # center tap: mask is all-ones
            img = img * mask_ref[tap]
        stk_ref[tap * C:(tap + 1) * C, col0:col0 + HW] = img.astype(stk_ref.dtype)


# ------------------------------- fused kernel -------------------------------

def _resnet_block_kernel(x_ref, temb_ref,
                         g1_ref, b1_ref, w1_ref,
                         g2_ref, b2_ref, w2_ref, cb2_ref, mask_ref,
                         *rest, B, H, W, cin, cout, has_sample):
    """Whole ResNet block for the whole (small) batch, resident in VMEM.

    x_ref   : (Cin, B*HW)    input, channel-major / pixel(+batch)-lane layout
    temb_ref: (Cout, B)      SiLU(t) @ W_t + b_t + conv1_b (bias pre-folded)
    g*,b*   : (C, 1)         GroupNorm affine
    w*_ref  : (Cout, 9*C)    conv weights flattened over (tap, cin)
    cb2_ref : (Cout, 1)      conv2_b (+ sample_b if projecting)
    mask_ref: (9, 1, HW)     0/1 f32 zero-padding masks per tap
    sw_ref  : (Cout, Cin)    optional 1x1 skip projection
    o_ref   : (Cout, B*HW)
    stk_ref : (9*Cmax, B*HW) scratch: stacked conv operand
    """
    if has_sample:
        sw_ref, o_ref, stk_ref = rest
    else:
        o_ref, stk_ref = rest
    HW = H * W

    g1 = g1_ref[...].astype(jnp.float32)
    bb1 = b1_ref[...].astype(jnp.float32)
    g2 = g2_ref[...].astype(jnp.float32)
    bb2 = b2_ref[...].astype(jnp.float32)

    # --- enc1: per-sample GN1 + SiLU, stack the 9 taps -----------------------
    for b in range(B):
        cs = slice(b * HW, (b + 1) * HW)
        a1 = _gn_silu(x_ref[:, cs].astype(jnp.float32), g1, bb1)
        _write_taps(a1, mask_ref, stk_ref, b * HW, H, W)
    # one MXU matmul for the whole conv1 over the whole batch
    h = jnp.dot(w1_ref[...].astype(MXU_IN_DTYPE), stk_ref[0:9 * cin, :],
                preferred_element_type=jnp.float32)            # (Cout, B*HW)

    # --- enc2: add (conv1_b + temb), per-sample GN2 + SiLU, stack taps -------
    for b in range(B):
        cs = slice(b * HW, (b + 1) * HW)
        h_b = h[:, cs] + temb_ref[:, b:b + 1].astype(jnp.float32)
        a2 = _gn_silu(h_b, g2, bb2)
        _write_taps(a2, mask_ref, stk_ref, b * HW, H, W)
    h2 = jnp.dot(w2_ref[...].astype(MXU_IN_DTYPE), stk_ref[0:9 * cout, :],
                 preferred_element_type=jnp.float32)           # (Cout, B*HW)
    h2 = h2 + cb2_ref[...].astype(jnp.float32)                 # conv2_b (+sample_b)

    # --- skip branch: 1x1 projection is one matmul on the resident input ----
    x_all = x_ref[...].astype(jnp.float32)
    if has_sample:
        skip = jnp.dot(sw_ref[...].astype(MXU_IN_DTYPE),
                       x_all.astype(MXU_IN_DTYPE),
                       preferred_element_type=jnp.float32)
    else:
        skip = x_all                                           # Cin == Cout

    o_ref[...] = (h2 + skip).astype(o_ref.dtype)               # one lane-dense store


# --------------------------------- wrapper -----------------------------------

def _edge_masks(H, W):
    """0/1 f32 masks (9, 1, H*W): mask[tap] = 1 where the tap's source pixel
    lies inside the image (same-padding zero elsewhere)."""
    yy, xx = jnp.meshgrid(jnp.arange(H), jnp.arange(W), indexing="ij")
    yy = yy.reshape(1, H * W)
    xx = xx.reshape(1, H * W)
    ms = []
    for tap in range(9):
        dy, dx = tap // 3 - 1, tap % 3 - 1
        m = (yy + dy >= 0) & (yy + dy < H) & (xx + dx >= 0) & (xx + dx < W)
        ms.append(m)
    return jnp.stack(ms).astype(jnp.float32)                   # (9, 1, HW)


def resnet_forward(params, x_nchw, t):
    """Forward pass matching the PyTorch module.  x_nchw: (B, Cin, H, W)."""
    B, Cin, H, W = x_nchw.shape
    Cout = params["conv1_w"].shape[-1]
    HW = H * W
    has_sample = params.get("sample_w") is not None
    if not has_sample:
        assert Cin == Cout, "identity skip requires in_channels == out_channels"

    # Time-embedding MLP: tiny (B,T)@(T,Cout); plain JAX. conv1 bias folded in.
    temb = jax.nn.silu(t) @ params["t_w"] + params["t_b"]              # (B, Cout)
    temb = (temb + params["conv1_b"].reshape(1, Cout)).T               # (Cout, B)

    # Fold sample_b into conv2's bias (both just add to the output).
    cb2 = params["conv2_b"].reshape(Cout, 1)
    if has_sample:
        cb2 = cb2 + params["sample_b"].reshape(Cout, 1)

    # Conv weights HWIO (3,3,Ci,Co) -> (Co, 9*Ci), K ordered (tap, cin) to
    # match the stacked operand layout in the kernel.
    def wflat(w_hwio):
        kh, kw, ci, co = w_hwio.shape
        return jnp.transpose(w_hwio.reshape(kh * kw, ci, co),
                             (2, 0, 1)).reshape(co, kh * kw * ci)

    # Lane-dense activation layout: (Cin, B*HW), pixels (and batch) on lanes.
    x = jnp.transpose(x_nchw.reshape(B, Cin, HW), (1, 0, 2)).reshape(Cin, B * HW)

    in_arrays = [
        x, temb,
        params["gn1_g"].reshape(Cin, 1), params["gn1_b"].reshape(Cin, 1),
        wflat(params["conv1_w"]),
        params["gn2_g"].reshape(Cout, 1), params["gn2_b"].reshape(Cout, 1),
        wflat(params["conv2_w"]), cb2,
        _edge_masks(H, W),
    ]
    if has_sample:
        in_arrays.append(params["sample_w"].T)                         # (Cout, Cin)

    # Every array is one full-extent block (single grid step, whole batch).
    in_specs = [pl.BlockSpec(tuple(a.shape), lambda i, n=a.ndim: (0,) * n)
                for a in in_arrays]

    kernel = functools.partial(_resnet_block_kernel, B=B, H=H, W=W,
                               cin=Cin, cout=Cout, has_sample=has_sample)
    cmax = max(Cin, Cout)
    out = pl.pallas_call(
        kernel,
        out_shape=jax.ShapeDtypeStruct((Cout, B * HW), x_nchw.dtype),
        grid=(1,),
        in_specs=in_specs,
        out_specs=pl.BlockSpec((Cout, B * HW), lambda i: (0, 0)),
        scratch_shapes=[pltpu.VMEM((9 * cmax, B * HW), MXU_IN_DTYPE)],
        compiler_params=pltpu.CompilerParams(
            dimension_semantics=("arbitrary",),
            vmem_limit_bytes=32 * 1024 * 1024),   # explicit budget (v7x: 64 MiB phys)
    )(*in_arrays)

    # (Cout, B*HW) -> (B, Cout, H, W)
    return jnp.transpose(out.reshape(Cout, B, H, W), (1, 0, 2, 3))


# --------------------------------- reference ---------------------------------

def resnet_reference(params, x, t):
    """Pure-JAX NCHW reference matching the PyTorch semantics."""
    def gn_silu_ref(x, g, b):
        mean = jnp.mean(x, axis=(1, 2, 3), keepdims=True)
        var = jnp.var(x, axis=(1, 2, 3), keepdims=True)
        y = (x - mean) / jnp.sqrt(var + EPS)
        y = y * g.reshape(1, -1, 1, 1) + b.reshape(1, -1, 1, 1)
        return y * jax.nn.sigmoid(y)

    def conv3x3_ref(x, w_hwio, b):
        w_oihw = jnp.transpose(w_hwio, (3, 2, 0, 1))
        y = jax.lax.conv_general_dilated(
            x, w_oihw, (1, 1), ((1, 1), (1, 1)),
            dimension_numbers=("NCHW", "OIHW", "NCHW"),
            precision=jax.lax.Precision.HIGHEST)
        return y + b.reshape(1, -1, 1, 1)

    temb = jax.nn.silu(t) @ params["t_w"] + params["t_b"]              # (B, Cout)
    h = conv3x3_ref(gn_silu_ref(x, params["gn1_g"], params["gn1_b"]),
                    params["conv1_w"], params["conv1_b"])
    h = h + temb.reshape(x.shape[0], -1, 1, 1)
    h = conv3x3_ref(gn_silu_ref(h, params["gn2_g"], params["gn2_b"]),
                    params["conv2_w"], params["conv2_b"])
    if params.get("sample_w") is not None:
        xs = jnp.einsum("bchw,co->bohw", x, params["sample_w"]) \
            + params["sample_b"].reshape(1, -1, 1, 1)
    else:
        xs = x
    return h + xs


# ----------------------------------- main ------------------------------------

if __name__ == "__main__":
    B, Cin, Cout, H, W, T = 2, 4, 8, 16, 16, 32
    key = jax.random.PRNGKey(0)
    k = jax.random.split(key, 10)

    # Deterministic synthetic parameters (shapes follow the PyTorch __init__).
    params = dict(
        gn1_g=jnp.ones((1, Cin), jnp.float32),
        gn1_b=jnp.zeros((1, Cin), jnp.float32),
        conv1_w=0.1 * jax.random.normal(k[0], (3, 3, Cin, Cout), jnp.float32),
        conv1_b=0.1 * jax.random.normal(k[1], (1, Cout), jnp.float32),
        gn2_g=jnp.ones((1, Cout), jnp.float32),
        gn2_b=jnp.zeros((1, Cout), jnp.float32),
        conv2_w=0.1 * jax.random.normal(k[2], (3, 3, Cout, Cout), jnp.float32),
        conv2_b=0.1 * jax.random.normal(k[3], (1, Cout), jnp.float32),
        t_w=0.1 * jax.random.normal(k[4], (T, Cout), jnp.float32),
        t_b=0.1 * jax.random.normal(k[5], (1, Cout), jnp.float32),
        sample_w=0.1 * jax.random.normal(k[6], (Cin, Cout), jnp.float32),  # 1x1 conv
        sample_b=0.1 * jax.random.normal(k[7], (1, Cout), jnp.float32),
    )

    x = jax.random.normal(k[8], (B, Cin, H, W), jnp.float32)  # NCHW like PyTorch
    t = jax.random.normal(k[9], (B, T), jnp.float32)

    fwd = jax.jit(resnet_forward)
    out = jax.block_until_ready(fwd(params, x, t))
    assert out.shape == (B, Cout, H, W)

    ref = resnet_reference(params, x, t)
    max_err = float(jnp.max(jnp.abs(out - ref)))
    assert jnp.allclose(out, ref, atol=2e-2, rtol=2e-2), max_err

    print("KERNEL_OK")
</pallas_src>

<mosaic_0001>
module attributes {stable_mosaic.version = 11 : i64} {
  func.func @_resnet_block_kernel(%arg0: i32, %arg1: memref<4x512xf32, #tpu.memory_space<vmem>>, %arg2: memref<8x2xf32, #tpu.memory_space<vmem>>, %arg3: memref<4x1xf32, #tpu.memory_space<vmem>>, %arg4: memref<4x1xf32, #tpu.memory_space<vmem>>, %arg5: memref<8x36xf32, #tpu.memory_space<vmem>>, %arg6: memref<8x1xf32, #tpu.memory_space<vmem>>, %arg7: memref<8x1xf32, #tpu.memory_space<vmem>>, %arg8: memref<8x72xf32, #tpu.memory_space<vmem>>, %arg9: memref<8x1xf32, #tpu.memory_space<vmem>>, %arg10: memref<9x1x256xf32, #tpu.memory_space<vmem>>, %arg11: memref<8x4xf32, #tpu.memory_space<vmem>>, %arg12: memref<8x512xf32, #tpu.memory_space<vmem>>, %arg13: memref<72x512xf32, #tpu.memory_space<vmem>>) attributes {dimension_semantics = [#tpu.dimension_semantics<arbitrary>], iteration_bounds = array<i64: 1>, scalar_prefetch = 0 : i64, scratch_operands = 1 : i64, tpu.core_type = #tpu.core_type<tc>, window_params = [{pipeline_mode = #tpu.pipeline_mode<synchronous>, transform_indices = @transform_0, window_bounds = array<i64: 4, 512>}, {pipeline_mode = #tpu.pipeline_mode<synchronous>, transform_indices = @transform_1, window_bounds = array<i64: 8, 2>}, {pipeline_mode = #tpu.pipeline_mode<synchronous>, transform_indices = @transform_2, window_bounds = array<i64: 4, 1>}, {pipeline_mode = #tpu.pipeline_mode<synchronous>, transform_indices = @transform_3, window_bounds = array<i64: 4, 1>}, {pipeline_mode = #tpu.pipeline_mode<synchronous>, transform_indices = @transform_4, window_bounds = array<i64: 8, 36>}, {pipeline_mode = #tpu.pipeline_mode<synchronous>, transform_indices = @transform_5, window_bounds = array<i64: 8, 1>}, {pipeline_mode = #tpu.pipeline_mode<synchronous>, transform_indices = @transform_6, window_bounds = array<i64: 8, 1>}, {pipeline_mode = #tpu.pipeline_mode<synchronous>, transform_indices = @transform_7, window_bounds = array<i64: 8, 72>}, {pipeline_mode = #tpu.pipeline_mode<synchronous>, transform_indices = @transform_8, window_bounds = array<i64: 8, 1>}, {pipeline_mode = #tpu.pipeline_mode<synchronous>, transform_indices = @transform_9, window_bounds = array<i64: 9, 1, 256>}, {pipeline_mode = #tpu.pipeline_mode<synchronous>, transform_indices = @transform_10, window_bounds = array<i64: 8, 4>}, {pipeline_mode = #tpu.pipeline_mode<synchronous>, transform_indices = @transform_11, window_bounds = array<i64: 8, 512>}]} {
    %c0 = arith.constant 0 : index
    %c0_0 = arith.constant 0 : index
    %0 = vector.load %arg3[%c0, %c0_0] : memref<4x1xf32, #tpu.memory_space<vmem>>, vector<4x1xf32>
    %c0_1 = arith.constant 0 : index
    %c0_2 = arith.constant 0 : index
    %1 = vector.load %arg4[%c0_1, %c0_2] : memref<4x1xf32, #tpu.memory_space<vmem>>, vector<4x1xf32>
    %c0_3 = arith.constant 0 : index
    %c0_4 = arith.constant 0 : index
    %2 = vector.load %arg6[%c0_3, %c0_4] : memref<8x1xf32, #tpu.memory_space<vmem>>, vector<8x1xf32>
    %c0_5 = arith.constant 0 : index
    %c0_6 = arith.constant 0 : index
    %3 = vector.load %arg7[%c0_5, %c0_6] : memref<8x1xf32, #tpu.memory_space<vmem>>, vector<8x1xf32>
    %c0_7 = arith.constant 0 : index
    %c0_8 = arith.constant 0 : index
    %4 = vector.load %arg1[%c0_7, %c0_8] : memref<4x512xf32, #tpu.memory_space<vmem>>, vector<4x256xf32>
    %cst = arith.constant 1.000000e+00 : f32
    %5 = vector.broadcast %cst : f32 to vector<256x1xf32>
    %cst_9 = arith.constant dense<0.000000e+00> : vector<4x1xf32>
    %6 = tpu.matmul %4, %5, %cst_9 {dimension_numbers = #tpu.dot_dimension_numbers<[1], [0], [0], [1], [0, 0, 1, 1], [], []>} : vector<4x256xf32>, vector<256x1xf32>, vector<4x1xf32> -> vector<4x1xf32>
    %7 = arith.mulf %4, %4 : vector<4x256xf32>
    %cst_10 = arith.constant dense<0.000000e+00> : vector<4x1xf32>
    %8 = tpu.matmul %7, %5, %cst_10 {dimension_numbers = #tpu.dot_dimension_numbers<[1], [0], [0], [1], [0, 0, 1, 1], [], []>} : vector<4x256xf32>, vector<256x1xf32>, vector<4x1xf32> -> vector<4x1xf32>
    %9 = vector.shape_cast %6 : vector<4x1xf32> to vector<1x4x1xf32>
    %cst_11 = arith.constant dense<0.000000e+00> : vector<1xf32>
    %10 = vector.multi_reduction <add>, %9, %cst_11 [1, 2] : vector<1x4x1xf32> to vector<1xf32>
    %11 = vector.shape_cast %10 : vector<1xf32> to vector<1x1x1xf32>
    %12 = vector.extract %11[0, 0, 0] : f32 from vector<1x1x1xf32>
    %13 = vector.broadcast %12 : f32 to vector<1x1xf32>
    %cst_12 = arith.constant 1.024000e+03 : f32
    %14 = vector.broadcast %cst_12 : f32 to vector<1x1xf32>
    %15 = arith.divf %13, %14 : vector<1x1xf32>
    %16 = vector.shape_cast %8 : vector<4x1xf32> to vector<1x4x1xf32>
    %cst_13 = arith.constant dense<0.000000e+00> : vector<1xf32>
    %17 = vector.multi_reduction <add>, %16, %cst_13 [1, 2] : vector<1x4x1xf32> to vector<1xf32>
    %18 = vector.shape_cast %17 : vector<1xf32> to vector<1x1x1xf32>
    %19 = vector.extract %18[0, 0, 0] : f32 from vector<1x1x1xf32>
    %20 = vector.broadcast %19 : f32 to vector<1x1xf32>
    %cst_14 = arith.constant 1.024000e+03 : f32
    %21 = vector.broadcast %cst_14 : f32 to vector<1x1xf32>
    %22 = arith.divf %20, %21 : vector<1x1xf32>
    %23 = arith.mulf %15, %15 : vector<1x1xf32>
    %24 = arith.subf %22, %23 : vector<1x1xf32>
    %cst_15 = arith.constant 9.99999974E-6 : f32
    %25 = vector.broadcast %cst_15 : f32 to vector<1x1xf32>
    %26 = arith.addf %24, %25 : vector<1x1xf32>
    %27 = math.rsqrt %26 : vector<1x1xf32>
    %28 = vector.broadcast %27 : vector<1x1xf32> to vector<4x1xf32>
    %29 = arith.mulf %28, %0 : vector<4x1xf32>
    %30 = vector.broadcast %15 : vector<1x1xf32> to vector<4x1xf32>
    %31 = arith.mulf %30, %29 : vector<4x1xf32>
    %32 = arith.subf %1, %31 : vector<4x1xf32>
    %33 = vector.broadcast %29 : vector<4x1xf32> to vector<4x256xf32>
    %34 = arith.mulf %4, %33 : vector<4x256xf32>
    %35 = vector.broadcast %32 : vector<4x1xf32> to vector<4x256xf32>
    %36 = arith.addf %34, %35 : vector<4x256xf32>
    %37 = arith.negf %36 : vector<4x256xf32>
    %38 = math.exp %37 : vector<4x256xf32>
    %cst_16 = arith.constant 1.000000e+00 : f32
    %39 = vector.broadcast %cst_16 : f32 to vector<4x256xf32>
    %40 = arith.addf %39, %38 : vector<4x256xf32>
    %41 = arith.divf %39, %40 : vector<4x256xf32>
    %42 = arith.mulf %36, %41 : vector<4x256xf32>
    %c17_i32 = arith.constant 17 : i32
    %43 = tpu.dynamic_rotate %42 by %c17_i32 dim 1 : vector<4x256xf32>, i32 -> vector<4x256xf32>
    %c0_17 = arith.constant 0 : index
    %c0_18 = arith.constant 0 : index
    %c0_19 = arith.constant 0 : index
    %44 = vector.load %arg10[%c0_17, %c0_18, %c0_19] : memref<9x1x256xf32, #tpu.memory_space<vmem>>, vector<1x1x256xf32>
    %45 = vector.shape_cast %44 : vector<1x1x256xf32> to vector<1x256xf32>
    %46 = vector.broadcast %45 : vector<1x256xf32> to vector<4x256xf32>
    %47 = arith.mulf %43, %46 : vector<4x256xf32>
    %c0_20 = arith.constant 0 : index
    %c0_21 = arith.constant 0 : index
    %48 = vector.load %arg13[%c0_20, %c0_21] : memref<72x512xf32, #tpu.memory_space<vmem>>, vector<4x256xf32>
    tpu.vector_store %arg13[%c0_20, %c0_21], %47 {strides = array<i32>} : memref<72x512xf32, #tpu.memory_space<vmem>>, vector<4x256xf32>,
    %c16_i32 = arith.constant 16 : i32
    %49 = tpu.dynamic_rotate %42 by %c16_i32 dim 1 : vector<4x256xf32>, i32 -> vector<4x256xf32>
    %c1 = arith.constant 1 : index
    %c0_22 = arith.constant 0 : index
    %c0_23 = arith.constant 0 : index
    %50 = vector.load %arg10[%c1, %c0_22, %c0_23] : memref<9x1x256xf32, #tpu.memory_space<vmem>>, vector<1x1x256xf32>
    %51 = vector.shape_cast %50 : vector<1x1x256xf32> to vector<1x256xf32>
    %52 = vector.broadcast %51 : vector<1x256xf32> to vector<4x256xf32>
    %53 = arith.mulf %49, %52 : vector<4x256xf32>
    %c4 = arith.constant 4 : index
    %c0_24 = arith.constant 0 : index
    %54 = vector.load %arg13[%c4, %c0_24] : memref<72x512xf32, #tpu.memory_space<vmem>>, vector<4x256xf32>
    tpu.vector_store %arg13[%c4, %c0_24], %53 {strides = array<i32>} : memref<72x512xf32, #tpu.memory_space<vmem>>, vector<4x256xf32>,
    %c15_i32 = arith.constant 15 : i32
    %55 = tpu.dynamic_rotate %42 by %c15_i32 dim 1 : vector<4x256xf32>, i32 -> vector<4x256xf32>
    %c2 = arith.constant 2 : index
    %c0_25 = arith.constant 0 : index
    %c0_26 = arith.constant 0 : index
    %56 = vector.load %arg10[%c2, %c0_25, %c0_26] : memref<9x1x256xf32, #tpu.memory_space<vmem>>, vector<1x1x256xf32>
    %57 = vector.shape_cast %56 : vector<1x1x256xf32> to vector<1x256xf32>
    %58 = vector.broadcast %57 : vector<1x256xf32> to vector<4x256xf32>
    %59 = arith.mulf %55, %58 : vector<4x256xf32>
    %c8 = arith.constant 8 : index
    %c0_27 = arith.constant 0 : index
    %60 = vector.load %arg13[%c8, %c0_27] : memref<72x512xf32, #tpu.memory_space<vmem>>, vector<4x256xf32>
    tpu.vector_store %arg13[%c8, %c0_27], %59 {strides = array<i32>} : memref<72x512xf32, #tpu.memory_space<vmem>>, vector<4x256xf32>,
    %c1_i32 = arith.constant 1 : i32
    %61 = tpu.dynamic_rotate %42 by %c1_i32 dim 1 : vector<4x256xf32>, i32 -> vector<4x256xf32>
    %c3 = arith.constant 3 : index
    %c0_28 = arith.constant 0 : index
    %c0_29 = arith.constant 0 : index
    %62 = vector.load %arg10[%c3, %c0_28, %c0_29] : memref<9x1x256xf32, #tpu.memory_space<vmem>>, vector<1x1x256xf32>
    %63 = vector.shape_cast %62 : vector<1x1x256xf32> to vector<1x256xf32>
    %64 = vector.broadcast %63 : vector<1x256xf32> to vector<4x256xf32>
    %65 = arith.mulf %61, %64 : vector<4x256xf32>
    %c12 = arith.constant 12 : index
    %c0_30 = arith.constant 0 : index
    %66 = vector.load %arg13[%c12, %c0_30] : memref<72x512xf32, #tpu.memory_space<vmem>>, vector<4x256xf32>
    tpu.vector_store %arg13[%c12, %c0_30], %65 {strides = array<i32>} : memref<72x512xf32, #tpu.memory_space<vmem>>, vector<4x256xf32>,
    %c16 = arith.constant 16 : index
    %c0_31 = arith.constant 0 : index
    %67 = vector.load %arg13[%c16, %c0_31] : memref<72x512xf32, #tpu.memory_space<vmem>>, vector<4x256xf32>
    tpu.vector_store %arg13[%c16, %c0_31], %42 {strides = array<i32>} : memref<72x512xf32, #tpu.memory_space<vmem>>, vector<4x256xf32>,
    %c255_i32 = arith.constant 255 : i32
    %68 = tpu.dynamic_rotate %42 by %c255_i32 dim 1 : vector<4x256xf32>, i32 -> vector<4x256xf32>
    %c5 = arith.constant 5 : index
    %c0_32 = arith.constant 0 : index
    %c0_33 = arith.constant 0 : index
    %69 = vector.load %arg10[%c5, %c0_32, %c0_33] : memref<9x1x256xf32, #tpu.memory_space<vmem>>, vector<1x1x256xf32>
    %70 = vector.shape_cast %69 : vector<1x1x256xf32> to vector<1x256xf32>
    %71 = vector.broadcast %70 : vector<1x256xf32> to vector<4x256xf32>
    %72 = arith.mulf %68, %71 : vector<4x256xf32>
    %c20 = arith.constant 20 : index
    %c0_34 = arith.constant 0 : index
    %73 = vector.load %arg13[%c20, %c0_34] : memref<72x512xf32, #tpu.memory_space<vmem>>, vector<4x256xf32>
    tpu.vector_store %arg13[%c20, %c0_34], %72 {strides = array<i32>} : memref<72x512xf32, #tpu.memory_space<vmem>>, vector<4x256xf32>,
    %c241_i32 = arith.constant 241 : i32
    %74 = tpu.dynamic_rotate %42 by %c241_i32 dim 1 : vector<4x256xf32>, i32 -> vector<4x256xf32>
    %c6 = arith.constant 6 : index
    %c0_35 = arith.constant 0 : index
    %c0_36 = arith.constant 0 : index
    %75 = vector.load %arg10[%c6, %c0_35, %c0_36] : memref<9x1x256xf32, #tpu.memory_space<vmem>>, vector<1x1x256xf32>
    %76 = vector.shape_cast %75 : vector<1x1x256xf32> to vector<1x256xf32>
    %77 = vector.broadcast %76 : vector<1x256xf32> to vector<4x256xf32>
    %78 = arith.mulf %74, %77 : vector<4x256xf32>
    %c24 = arith.constant 24 : index
    %c0_37 = arith.constant 0 : index
    %79 = vector.load %arg13[%c24, %c0_37] : memref<72x512xf32, #tpu.memory_space<vmem>>, vector<4x256xf32>
    tpu.vector_store %arg13[%c24, %c0_37], %78 {strides = array<i32>} : memref<72x512xf32, #tpu.memory_space<vmem>>, vector<4x256xf32>,
    %c240_i32 = arith.constant 240 : i32
    %80 = tpu.dynamic_rotate %42 by %c240_i32 dim 1 : vector<4x256xf32>, i32 -> vector<4x256xf32>
    %c7 = arith.constant 7 : index
    %c0_38 = arith.constant 0 : index
    %c0_39 = arith.constant 0 : index
    %81 = vector.load %arg10[%c7, %c0_38, %c0_39] : memref<9x1x256xf32, #tpu.memory_space<vmem>>, vector<1x1x256xf32>
    %82 = vector.shape_cast %81 : vector<1x1x256xf32> to vector<1x256xf32>
    %83 = vector.broadcast %82 : vector<1x256xf32> to vector<4x256xf32>
    %84 = arith.mulf %80, %83 : vector<4x256xf32>
    %c28 = arith.constant 28 : index
    %c0_40 = arith.constant 0 : index
    %85 = vector.load %arg13[%c28, %c0_40] : memref<72x512xf32, #tpu.memory_space<vmem>>, vector<4x256xf32>
    tpu.vector_store %arg13[%c28, %c0_40], %84 {strides = array<i32>} : memref<72x512xf32, #tpu.memory_space<vmem>>, vector<4x256xf32>,
    %c239_i32 = arith.constant 239 : i32
    %86 = tpu.dynamic_rotate %42 by %c239_i32 dim 1 : vector<4x256xf32>, i32 -> vector<4x256xf32>
    %c8_41 = arith.constant 8 : index
    %c0_42 = arith.constant 0 : index
    %c0_43 = arith.constant 0 : index
    %87 = vector.load %arg10[%c8_41, %c0_42, %c0_43] : memref<9x1x256xf32, #tpu.memory_space<vmem>>, vector<1x1x256xf32>
    %88 = vector.shape_cast %87 : vector<1x1x256xf32> to vector<1x256xf32>
    %89 = vector.broadcast %88 : vector<1x256xf32> to vector<4x256xf32>
    %90 = arith.mulf %86, %89 : vector<4x256xf32>
    %c32 = arith.constant 32 : index
    %c0_44 = arith.constant 0 : index
    %91 = vector.load %arg13[%c32, %c0_44] : memref<72x512xf32, #tpu.memory_space<vmem>>, vector<4x256xf32>
    tpu.vector_store %arg13[%c32, %c0_44], %90 {strides = array<i32>} : memref<72x512xf32, #tpu.memory_space<vmem>>, vector<4x256xf32>,
    %c0_45 = arith.constant 0 : index
    %c256 = arith.constant 256 : index
    %92 = vector.load %arg1[%c0_45, %c256] : memref<4x512xf32, #tpu.memory_space<vmem>>, vector<4x256xf32>
    %cst_46 = arith.constant 1.000000e+00 : f32
    %93 = vector.broadcast %cst_46 : f32 to vector<256x1xf32>
    %cst_47 = arith.constant dense<0.000000e+00> : vector<4x1xf32>
    %94 = tpu.matmul %92, %93, %cst_47 {dimension_numbers = #tpu.dot_dimension_numbers<[1], [0], [0], [1], [0, 0, 1, 1], [], []>} : vector<4x256xf32>, vector<256x1xf32>, vector<4x1xf32> -> vector<4x1xf32>
    %95 = arith.mulf %92, %92 : vector<4x256xf32>
    %cst_48 = arith.constant dense<0.000000e+00> : vector<4x1xf32>
    %96 = tpu.matmul %95, %93, %cst_48 {dimension_numbers = #tpu.dot_dimension_numbers<[1], [0], [0], [1], [0, 0, 1, 1], [], []>} : vector<4x256xf32>, vector<256x1xf32>, vector<4x1xf32> -> vector<4x1xf32>
    %97 = vector.shape_cast %94 : vector<4x1xf32> to vector<1x4x1xf32>
    %cst_49 = arith.constant dense<0.000000e+00> : vector<1xf32>
    %98 = vector.multi_reduction <add>, %97, %cst_49 [1, 2] : vector<1x4x1xf32> to vector<1xf32>
    %99 = vector.shape_cast %98 : vector<1xf32> to vector<1x1x1xf32>
    %100 = vector.extract %99[0, 0, 0] : f32 from vector<1x1x1xf32>
    %101 = vector.broadcast %100 : f32 to vector<1x1xf32>
    %cst_50 = arith.constant 1.024000e+03 : f32
    %102 = vector.broadcast %cst_50 : f32 to vector<1x1xf32>
    %103 = arith.divf %101, %102 : vector<1x1xf32>
    %104 = vector.shape_cast %96 : vector<4x1xf32> to vector<1x4x1xf32>
    %cst_51 = arith.constant dense<0.000000e+00> : vector<1xf32>
    %105 = vector.multi_reduction <add>, %104, %cst_51 [1, 2] : vector<1x4x1xf32> to vector<1xf32>
    %106 = vector.shape_cast %105 : vector<1xf32> to vector<1x1x1xf32>
    %107 = vector.extract %106[0, 0, 0] : f32 from vector<1x1x1xf32>
    %108 = vector.broadcast %107 : f32 to vector<1x1xf32>
    %cst_52 = arith.constant 1.024000e+03 : f32
    %109 = vector.broadcast %cst_52 : f32 to vector<1x1xf32>
    %110 = arith.divf %108, %109 : vector<1x1xf32>
    %111 = arith.mulf %103, %103 : vector<1x1xf32>
    %112 = arith.subf %110, %111 : vector<1x1xf32>
    %cst_53 = arith.constant 9.99999974E-6 : f32
    %113 = vector.broadcast %cst_53 : f32 to vector<1x1xf32>
    %114 = arith.addf %112, %113 : vector<1x1xf32>
    %115 = math.rsqrt %114 : vector<1x1xf32>
    %116 = vector.broadcast %115 : vector<1x1xf32> to vector<4x1xf32>
    %117 = arith.mulf %116, %0 : vector<4x1xf32>
    %118 = vector.broadcast %103 : vector<1x1xf32> to vector<4x1xf32>
    %119 = arith.mulf %118, %117 : vector<4x1xf32>
    %120 = arith.subf %1, %119 : vector<4x1xf32>
    %121 = vector.broadcast %117 : vector<4x1xf32> to vector<4x256xf32>
    %122 = arith.mulf %92, %121 : vector<4x256xf32>
    %123 = vector.broadcast %120 : vector<4x1xf32> to vector<4x256xf32>
    %124 = arith.addf %122, %123 : vector<4x256xf32>
    %125 = arith.negf %124 : vector<4x256xf32>
    %126 = math.exp %125 : vector<4x256xf32>
    %cst_54 = arith.constant 1.000000e+00 : f32
    %127 = vector.broadcast %cst_54 : f32 to vector<4x256xf32>
    %128 = arith.addf %127, %126 : vector<4x256xf32>
    %129 = arith.divf %127, %128 : vector<4x256xf32>
    %130 = arith.mulf %124, %129 : vector<4x256xf32>
    %c17_i32_55 = arith.constant 17 : i32
    %131 = tpu.dynamic_rotate %130 by %c17_i32_55 dim 1 : vector<4x256xf32>, i32 -> vector<4x256xf32>
    %c0_56 = arith.constant 0 : index
    %c0_57 = arith.constant 0 : index
    %c0_58 = arith.constant 0 : index
    %132 = vector.load %arg10[%c0_56, %c0_57, %c0_58] : memref<9x1x256xf32, #tpu.memory_space<vmem>>, vector<1x1x256xf32>
    %133 = vector.shape_cast %132 : vector<1x1x256xf32> to vector<1x256xf32>
    %134 = vector.broadcast %133 : vector<1x256xf32> to vector<4x256xf32>
    %135 = arith.mulf %131, %134 : vector<4x256xf32>
    %c0_59 = arith.constant 0 : index
    %c256_60 = arith.constant 256 : index
    %136 = vector.load %arg13[%c0_59, %c256_60] : memref<72x512xf32, #tpu.memory_space<vmem>>, vector<4x256xf32>
    tpu.vector_store %arg13[%c0_59, %c256_60], %135 {strides = array<i32>} : memref<72x512xf32, #tpu.memory_space<vmem>>, vector<4x256xf32>,
    %c16_i32_61 = arith.constant 16 : i32
    %137 = tpu.dynamic_rotate %130 by %c16_i32_61 dim 1 : vector<4x256xf32>, i32 -> vector<4x256xf32>
    %c1_62 = arith.constant 1 : index
    %c0_63 = arith.constant 0 : index
    %c0_64 = arith.constant 0 : index
    %138 = vector.load %arg10[%c1_62, %c0_63, %c0_64] : memref<9x1x256xf32, #tpu.memory_space<vmem>>, vector<1x1x256xf32>
    %139 = vector.shape_cast %138 : vector<1x1x256xf32> to vector<1x256xf32>
    %140 = vector.broadcast %139 : vector<1x256xf32> to vector<4x256xf32>
    %141 = arith.mulf %137, %140 : vector<4x256xf32>
    %c4_65 = arith.constant 4 : index
    %c256_66 = arith.constant 256 : index
    %142 = vector.load %arg13[%c4_65, %c256_66] : memref<72x512xf32, #tpu.memory_space<vmem>>, vector<4x256xf32>
    tpu.vector_store %arg13[%c4_65, %c256_66], %141 {strides = array<i32>} : memref<72x512xf32, #tpu.memory_space<vmem>>, vector<4x256xf32>,
    %c15_i32_67 = arith.constant 15 : i32
    %143 = tpu.dynamic_rotate %130 by %c15_i32_67 dim 1 : vector<4x256xf32>, i32 -> vector<4x256xf32>
    %c2_68 = arith.constant 2 : index
    %c0_69 = arith.constant 0 : index
    %c0_70 = arith.constant 0 : index
    %144 = vector.load %arg10[%c2_68, %c0_69, %c0_70] : memref<9x1x256xf32, #tpu.memory_space<vmem>>, vector<1x1x256xf32>
    %145 = vector.shape_cast %144 : vector<1x1x256xf32> to vector<1x256xf32>
    %146 = vector.broadcast %145 : vector<1x256xf32> to vector<4x256xf32>
    %147 = arith.mulf %143, %146 : vector<4x256xf32>
    %c8_71 = arith.constant 8 : index
    %c256_72 = arith.constant 256 : index
    %148 = vector.load %arg13[%c8_71, %c256_72] : memref<72x512xf32, #tpu.memory_space<vmem>>, vector<4x256xf32>
    tpu.vector_store %arg13[%c8_71, %c256_72], %147 {strides = array<i32>} : memref<72x512xf32, #tpu.memory_space<vmem>>, vector<4x256xf32>,
    %c1_i32_73 = arith.constant 1 : i32
    %149 = tpu.dynamic_rotate %130 by %c1_i32_73 dim 1 : vector<4x256xf32>, i32 -> vector<4x256xf32>
    %c3_74 = arith.constant 3 : index
    %c0_75 = arith.constant 0 : index
    %c0_76 = arith.constant 0 : index
    %150 = vector.load %arg10[%c3_74, %c0_75, %c0_76] : memref<9x1x256xf32, #tpu.memory_space<vmem>>, vector<1x1x256xf32>
    %151 = vector.shape_cast %150 : vector<1x1x256xf32> to vector<1x256xf32>
    %152 = vector.broadcast %151 : vector<1x256xf32> to vector<4x256xf32>
    %153 = arith.mulf %149, %152 : vector<4x256xf32>
    %c12_77 = arith.constant 12 : index
    %c256_78 = arith.constant 256 : index
    %154 = vector.load %arg13[%c12_77, %c256_78] : memref<72x512xf32, #tpu.memory_space<vmem>>, vector<4x256xf32>
    tpu.vector_store %arg13[%c12_77, %c256_78], %153 {strides = array<i32>} : memref<72x512xf32, #tpu.memory_space<vmem>>, vector<4x256xf32>,
    %c16_79 = arith.constant 16 : index
    %c256_80 = arith.constant 256 : index
    %155 = vector.load %arg13[%c16_79, %c256_80] : memref<72x512xf32, #tpu.memory_space<vmem>>, vector<4x256xf32>
    tpu.vector_store %arg13[%c16_79, %c256_80], %130 {strides = array<i32>} : memref<72x512xf32, #tpu.memory_space<vmem>>, vector<4x256xf32>,
    %c255_i32_81 = arith.constant 255 : i32
    %156 = tpu.dynamic_rotate %130 by %c255_i32_81 dim 1 : vector<4x256xf32>, i32 -> vector<4x256xf32>
    %c5_82 = arith.constant 5 : index
    %c0_83 = arith.constant 0 : index
    %c0_84 = arith.constant 0 : index
    %157 = vector.load %arg10[%c5_82, %c0_83, %c0_84] : memref<9x1x256xf32, #tpu.memory_space<vmem>>, vector<1x1x256xf32>
    %158 = vector.shape_cast %157 : vector<1x1x256xf32> to vector<1x256xf32>
    %159 = vector.broadcast %158 : vector<1x256xf32> to vector<4x256xf32>
    %160 = arith.mulf %156, %159 : vector<4x256xf32>
    %c20_85 = arith.constant 20 : index
    %c256_86 = arith.constant 256 : index
    %161 = vector.load %arg13[%c20_85, %c256_86] : memref<72x512xf32, #tpu.memory_space<vmem>>, vector<4x256xf32>
    tpu.vector_store %arg13[%c20_85, %c256_86], %160 {strides = array<i32>} : memref<72x512xf32, #tpu.memory_space<vmem>>, vector<4x256xf32>,
    %c241_i32_87 = arith.constant 241 : i32
    %162 = tpu.dynamic_rotate %130 by %c241_i32_87 dim 1 : vector<4x256xf32>, i32 -> vector<4x256xf32>
    %c6_88 = arith.constant 6 : index
    %c0_89 = arith.constant 0 : index
    %c0_90 = arith.constant 0 : index
    %163 = vector.load %arg10[%c6_88, %c0_89, %c0_90] : memref<9x1x256xf32, #tpu.memory_space<vmem>>, vector<1x1x256xf32>
    %164 = vector.shape_cast %163 : vector<1x1x256xf32> to vector<1x256xf32>
    %165 = vector.broadcast %164 : vector<1x256xf32> to vector<4x256xf32>
    %166 = arith.mulf %162, %165 : vector<4x256xf32>
    %c24_91 = arith.constant 24 : index
    %c256_92 = arith.constant 256 : index
    %167 = vector.load %arg13[%c24_91, %c256_92] : memref<72x512xf32, #tpu.memory_space<vmem>>, vector<4x256xf32>
    tpu.vector_store %arg13[%c24_91, %c256_92], %166 {strides = array<i32>} : memref<72x512xf32, #tpu.memory_space<vmem>>, vector<4x256xf32>,
    %c240_i32_93 = arith.constant 240 : i32
    %168 = tpu.dynamic_rotate %130 by %c240_i32_93 dim 1 : vector<4x256xf32>, i32 -> vector<4x256xf32>
    %c7_94 = arith.constant 7 : index
    %c0_95 = arith.constant 0 : index
    %c0_96 = arith.constant 0 : index
    %169 = vector.load %arg10[%c7_94, %c0_95, %c0_96] : memref<9x1x256xf32, #tpu.memory_space<vmem>>, vector<1x1x256xf32>
    %170 = vector.shape_cast %169 : vector<1x1x256xf32> to vector<1x256xf32>
    %171 = vector.broadcast %170 : vector<1x256xf32> to vector<4x256xf32>
    %172 = arith.mulf %168, %171 : vector<4x256xf32>
    %c28_97 = arith.constant 28 : index
    %c256_98 = arith.constant 256 : index
    %173 = vector.load %arg13[%c28_97, %c256_98] : memref<72x512xf32, #tpu.memory_space<vmem>>, vector<4x256xf32>
    tpu.vector_store %arg13[%c28_97, %c256_98], %172 {strides = array<i32>} : memref<72x512xf32, #tpu.memory_space<vmem>>, vector<4x256xf32>,
    %c239_i32_99 = arith.constant 239 : i32
    %174 = tpu.dynamic_rotate %130 by %c239_i32_99 dim 1 : vector<4x256xf32>, i32 -> vector<4x256xf32>
    %c8_100 = arith.constant 8 : index
    %c0_101 = arith.constant 0 : index
    %c0_102 = arith.constant 0 : index
    %175 = vector.load %arg10[%c8_100, %c0_101, %c0_102] : memref<9x1x256xf32, #tpu.memory_space<vmem>>, vector<1x1x256xf32>
    %176 = vector.shape_cast %175 : vector<1x1x256xf32> to vector<1x256xf32>
    %177 = vector.broadcast %176 : vector<1x256xf32> to vector<4x256xf32>
    %178 = arith.mulf %174, %177 : vector<4x256xf32>
    %c32_103 = arith.constant 32 : index
    %c256_104 = arith.constant 256 : index
    %179 = vector.load %arg13[%c32_103, %c256_104] : memref<72x512xf32, #tpu.memory_space<vmem>>, vector<4x256xf32>
    tpu.vector_store %arg13[%c32_103, %c256_104], %178 {strides = array<i32>} : memref<72x512xf32, #tpu.memory_space<vmem>>, vector<4x256xf32>,
    %c0_105 = arith.constant 0 : index
    %c0_106 = arith.constant 0 : index
    %180 = vector.load %arg5[%c0_105, %c0_106] : memref<8x36xf32, #tpu.memory_space<vmem>>, vector<8x36xf32>
    %c0_107 = arith.constant 0 : index
    %c0_108 = arith.constant 0 : index
    %181 = vector.load %arg13[%c0_107, %c0_108] : memref<72x512xf32, #tpu.memory_space<vmem>>, vector<36x512xf32>
    %cst_109 = arith.constant dense<0.000000e+00> : vector<8x512xf32>
    %182 = tpu.matmul %180, %181, %cst_109 {dimension_numbers = #tpu.dot_dimension_numbers<[1], [0], [0], [1], [0, 0, 1, 1], [], []>} : vector<8x36xf32>, vector<36x512xf32>, vector<8x512xf32> -> vector<8x512xf32>
    %183 = vector.extract_strided_slice %182 {offsets = [0, 0], sizes = [8, 256], strides = [1, 1]} : vector<8x512xf32> to vector<8x256xf32>
    %c0_110 = arith.constant 0 : index
    %c0_111 = arith.constant 0 : index
    %184 = vector.load %arg2[%c0_110, %c0_111] : memref<8x2xf32, #tpu.memory_space<vmem>>, vector<8x1xf32>
    %185 = vector.broadcast %184 : vector<8x1xf32> to vector<8x256xf32>
    %186 = arith.addf %183, %185 : vector<8x256xf32>
    %cst_112 = arith.constant 1.000000e+00 : f32
    %187 = vector.broadcast %cst_112 : f32 to vector<256x1xf32>
    %cst_113 = arith.constant dense<0.000000e+00> : vector<8x1xf32>
    %188 = tpu.matmul %186, %187, %cst_113 {dimension_numbers = #tpu.dot_dimension_numbers<[1], [0], [0], [1], [0, 0, 1, 1], [], []>} : vector<8x256xf32>, vector<256x1xf32>, vector<8x1xf32> -> vector<8x1xf32>
    %189 = arith.mulf %186, %186 : vector<8x256xf32>
    %cst_114 = arith.constant dense<0.000000e+00> : vector<8x1xf32>
    %190 = tpu.matmul %189, %187, %cst_114 {dimension_numbers = #tpu.dot_dimension_numbers<[1], [0], [0], [1], [0, 0, 1, 1], [], []>} : vector<8x256xf32>, vector<256x1xf32>, vector<8x1xf32> -> vector<8x1xf32>
    %191 = vector.shape_cast %188 : vector<8x1xf32> to vector<1x8x1xf32>
    %cst_115 = arith.constant dense<0.000000e+00> : vector<1xf32>
    %192 = vector.multi_reduction <add>, %191, %cst_115 [1, 2] : vector<1x8x1xf32> to vector<1xf32>
    %193 = vector.shape_cast %192 : vector<1xf32> to vector<1x1x1xf32>
    %194 = vector.extract %193[0, 0, 0] : f32 from vector<1x1x1xf32>
    %195 = vector.broadcast %194 : f32 to vector<1x1xf32>
    %cst_116 = arith.constant 2.048000e+03 : f32
    %196 = vector.broadcast %cst_116 : f32 to vector<1x1xf32>
    %197 = arith.divf %195, %196 : vector<1x1xf32>
    %198 = vector.shape_cast %190 : vector<8x1xf32> to vector<1x8x1xf32>
    %cst_117 = arith.constant dense<0.000000e+00> : vector<1xf32>
    %199 = vector.multi_reduction <add>, %198, %cst_117 [1, 2] : vector<1x8x1xf32> to vector<1xf32>
    %200 = vector.shape_cast %199 : vector<1xf32> to vector<1x1x1xf32>
    %201 = vector.extract %200[0, 0, 0] : f32 from vector<1x1x1xf32>
    %202 = vector.broadcast %201 : f32 to vector<1x1xf32>
    %cst_118 = arith.constant 2.048000e+03 : f32
    %203 = vector.broadcast %cst_118 : f32 to vector<1x1xf32>
    %204 = arith.divf %202, %203 : vector<1x1xf32>
    %205 = arith.mulf %197, %197 : vector<1x1xf32>
    %206 = arith.subf %204, %205 : vector<1x1xf32>
    %cst_119 = arith.constant 9.99999974E-6 : f32
    %207 = vector.broadcast %cst_119 : f32 to vector<1x1xf32>
    %208 = arith.addf %206, %207 : vector<1x1xf32>
    %209 = math.rsqrt %208 : vector<1x1xf32>
    %210 = vector.broadcast %209 : vector<1x1xf32> to vector<8x1xf32>
    %211 = arith.mulf %210, %2 : vector<8x1xf32>
    %212 = vector.broadcast %197 : vector<1x1xf32> to vector<8x1xf32>
    %213 = arith.mulf %212, %211 : vector<8x1xf32>
    %214 = arith.subf %3, %213 : vector<8x1xf32>
    %215 = vector.broadcast %211 : vector<8x1xf32> to vector<8x256xf32>
    %216 = arith.mulf %186, %215 : vector<8x256xf32>
    %217 = vector.broadcast %214 : vector<8x1xf32> to vector<8x256xf32>
    %218 = arith.addf %216, %217 : vector<8x256xf32>
    %219 = arith.negf %218 : vector<8x256xf32>
    %220 = math.exp %219 : vector<8x256xf32>
    %cst_120 = arith.constant 1.000000e+00 : f32
    %221 = vector.broadcast %cst_120 : f32 to vector<8x256xf32>
    %222 = arith.addf %221, %220 : vector<8x256xf32>
    %223 = arith.divf %221, %222 : vector<8x256xf32>
    %224 = arith.mulf %218, %223 : vector<8x256xf32>
    %c17_i32_121 = arith.constant 17 : i32
    %225 = tpu.dynamic_rotate %224 by %c17_i32_121 dim 1 : vector<8x256xf32>, i32 -> vector<8x256xf32>
    %c0_122 = arith.constant 0 : index
    %c0_123 = arith.constant 0 : index
    %c0_124 = arith.constant 0 : index
    %226 = vector.load %arg10[%c0_122, %c0_123, %c0_124] : memref<9x1x256xf32, #tpu.memory_space<vmem>>, vector<1x1x256xf32>
    %227 = vector.shape_cast %226 : vector<1x1x256xf32> to vector<1x256xf32>
    %228 = vector.broadcast %227 : vector<1x256xf32> to vector<8x256xf32>
    %229 = arith.mulf %225, %228 : vector<8x256xf32>
    %c0_125 = arith.constant 0 : index
    %c0_126 = arith.constant 0 : index
    %230 = vector.load %arg13[%c0_125, %c0_126] : memref<72x512xf32, #tpu.memory_space<vmem>>, vector<8x256xf32>
    tpu.vector_store %arg13[%c0_125, %c0_126], %229 {strides = array<i32>} : memref<72x512xf32, #tpu.memory_space<vmem>>, vector<8x256xf32>,
    %c16_i32_127 = arith.constant 16 : i32
    %231 = tpu.dynamic_rotate %224 by %c16_i32_127 dim 1 : vector<8x256xf32>, i32 -> vector<8x256xf32>
    %c1_128 = arith.constant 1 : index
    %c0_129 = arith.constant 0 : index
    %c0_130 = arith.constant 0 : index
    %232 = vector.load %arg10[%c1_128, %c0_129, %c0_130] : memref<9x1x256xf32, #tpu.memory_space<vmem>>, vector<1x1x256xf32>
    %233 = vector.shape_cast %232 : vector<1x1x256xf32> to vector<1x256xf32>
    %234 = vector.broadcast %233 : vector<1x256xf32> to vector<8x256xf32>
    %235 = arith.mulf %231, %234 : vector<8x256xf32>
    %c8_131 = arith.constant 8 : index
    %c0_132 = arith.constant 0 : index
    %236 = vector.load %arg13[%c8_131, %c0_132] : memref<72x512xf32, #tpu.memory_space<vmem>>, vector<8x256xf32>
    tpu.vector_store %arg13[%c8_131, %c0_132], %235 {strides = array<i32>} : memref<72x512xf32, #tpu.memory_space<vmem>>, vector<8x256xf32>,
    %c15_i32_133 = arith.constant 15 : i32
    %237 = tpu.dynamic_rotate %224 by %c15_i32_133 dim 1 : vector<8x256xf32>, i32 -> vector<8x256xf32>
    %c2_134 = arith.constant 2 : index
    %c0_135 = arith.constant 0 : index
    %c0_136 = arith.constant 0 : index
    %238 = vector.load %arg10[%c2_134, %c0_135, %c0_136] : memref<9x1x256xf32, #tpu.memory_space<vmem>>, vector<1x1x256xf32>
    %239 = vector.shape_cast %238 : vector<1x1x256xf32> to vector<1x256xf32>
    %240 = vector.broadcast %239 : vector<1x256xf32> to vector<8x256xf32>
    %241 = arith.mulf %237, %240 : vector<8x256xf32>
    %c16_137 = arith.constant 16 : index
    %c0_138 = arith.constant 0 : index
    %242 = vector.load %arg13[%c16_137, %c0_138] : memref<72x512xf32, #tpu.memory_space<vmem>>, vector<8x256xf32>
    tpu.vector_store %arg13[%c16_137, %c0_138], %241 {strides = array<i32>} : memref<72x512xf32, #tpu.memory_space<vmem>>, vector<8x256xf32>,
    %c1_i32_139 = arith.constant 1 : i32
    %243 = tpu.dynamic_rotate %224 by %c1_i32_139 dim 1 : vector<8x256xf32>, i32 -> vector<8x256xf32>
    %c3_140 = arith.constant 3 : index
    %c0_141 = arith.constant 0 : index
    %c0_142 = arith.constant 0 : index
    %244 = vector.load %arg10[%c3_140, %c0_141, %c0_142] : memref<9x1x256xf32, #tpu.memory_space<vmem>>, vector<1x1x256xf32>
    %245 = vector.shape_cast %244 : vector<1x1x256xf32> to vector<1x256xf32>
    %246 = vector.broadcast %245 : vector<1x256xf32> to vector<8x256xf32>
    %247 = arith.mulf %243, %246 : vector<8x256xf32>
    %c24_143 = arith.constant 24 : index
    %c0_144 = arith.constant 0 : index
    %248 = vector.load %arg13[%c24_143, %c0_144] : memref<72x512xf32, #tpu.memory_space<vmem>>, vector<8x256xf32>
    tpu.vector_store %arg13[%c24_143, %c0_144], %247 {strides = array<i32>} : memref<72x512xf32, #tpu.memory_space<vmem>>, vector<8x256xf32>,
    %c32_145 = arith.constant 32 : index
    %c0_146 = arith.constant 0 : index
    %249 = vector.load %arg13[%c32_145, %c0_146] : memref<72x512xf32, #tpu.memory_space<vmem>>, vector<8x256xf32>
    tpu.vector_store %arg13[%c32_145, %c0_146], %224 {strides = array<i32>} : memref<72x512xf32, #tpu.memory_space<vmem>>, vector<8x256xf32>,
    %c255_i32_147 = arith.constant 255 : i32
    %250 = tpu.dynamic_rotate %224 by %c255_i32_147 dim 1 : vector<8x256xf32>, i32 -> vector<8x256xf32>
    %c5_148 = arith.constant 5 : index
    %c0_149 = arith.constant 0 : index
    %c0_150 = arith.constant 0 : index
    %251 = vector.load %arg10[%c5_148, %c0_149, %c0_150] : memref<9x1x256xf32, #tpu.memory_space<vmem>>, vector<1x1x256xf32>
    %252 = vector.shape_cast %251 : vector<1x1x256xf32> to vector<1x256xf32>
    %253 = vector.broadcast %252 : vector<1x256xf32> to vector<8x256xf32>
    %254 = arith.mulf %250, %253 : vector<8x256xf32>
    %c40 = arith.constant 40 : index
    %c0_151 = arith.constant 0 : index
    %255 = vector.load %arg13[%c40, %c0_151] : memref<72x512xf32, #tpu.memory_space<vmem>>, vector<8x256xf32>
    tpu.vector_store %arg13[%c40, %c0_151], %254 {strides = array<i32>} : memref<72x512xf32, #tpu.memory_space<vmem>>, vector<8x256xf32>,
    %c241_i32_152 = arith.constant 241 : i32
    %256 = tpu.dynamic_rotate %224 by %c241_i32_152 dim 1 : vector<8x256xf32>, i32 -> vector<8x256xf32>
    %c6_153 = arith.constant 6 : index
    %c0_154 = arith.constant 0 : index
    %c0_155 = arith.constant 0 : index
    %257 = vector.load %arg10[%c6_153, %c0_154, %c0_155] : memref<9x1x256xf32, #tpu.memory_space<vmem>>, vector<1x1x256xf32>
    %258 = vector.shape_cast %257 : vector<1x1x256xf32> to vector<1x256xf32>
    %259 = vector.broadcast %258 : vector<1x256xf32> to vector<8x256xf32>
    %260 = arith.mulf %256, %259 : vector<8x256xf32>
    %c48 = arith.constant 48 : index
    %c0_156 = arith.constant 0 : index
    %261 = vector.load %arg13[%c48, %c0_156] : memref<72x512xf32, #tpu.memory_space<vmem>>, vector<8x256xf32>
    tpu.vector_store %arg13[%c48, %c0_156], %260 {strides = array<i32>} : memref<72x512xf32, #tpu.memory_space<vmem>>, vector<8x256xf32>,
    %c240_i32_157 = arith.constant 240 : i32
    %262 = tpu.dynamic_rotate %224 by %c240_i32_157 dim 1 : vector<8x256xf32>, i32 -> vector<8x256xf32>
    %c7_158 = arith.constant 7 : index
    %c0_159 = arith.constant 0 : index
    %c0_160 = arith.constant 0 : index
    %263 = vector.load %arg10[%c7_158, %c0_159, %c0_160] : memref<9x1x256xf32, #tpu.memory_space<vmem>>, vector<1x1x256xf32>
    %264 = vector.shape_cast %263 : vector<1x1x256xf32> to vector<1x256xf32>
    %265 = vector.broadcast %264 : vector<1x256xf32> to vector<8x256xf32>
    %266 = arith.mulf %262, %265 : vector<8x256xf32>
    %c56 = arith.constant 56 : index
    %c0_161 = arith.constant 0 : index
    %267 = vector.load %arg13[%c56, %c0_161] : memref<72x512xf32, #tpu.memory_space<vmem>>, vector<8x256xf32>
    tpu.vector_store %arg13[%c56, %c0_161], %266 {strides = array<i32>} : memref<72x512xf32, #tpu.memory_space<vmem>>, vector<8x256xf32>,
    %c239_i32_162 = arith.constant 239 : i32
    %268 = tpu.dynamic_rotate %224 by %c239_i32_162 dim 1 : vector<8x256xf32>, i32 -> vector<8x256xf32>
    %c8_163 = arith.constant 8 : index
    %c0_164 = arith.constant 0 : index
    %c0_165 = arith.constant 0 : index
    %269 = vector.load %arg10[%c8_163, %c0_164, %c0_165] : memref<9x1x256xf32, #tpu.memory_space<vmem>>, vector<1x1x256xf32>
    %270 = vector.shape_cast %269 : vector<1x1x256xf32> to vector<1x256xf32>
    %271 = vector.broadcast %270 : vector<1x256xf32> to vector<8x256xf32>
    %272 = arith.mulf %268, %271 : vector<8x256xf32>
    %c64 = arith.constant 64 : index
    %c0_166 = arith.constant 0 : index
    %273 = vector.load %arg13[%c64, %c0_166] : memref<72x512xf32, #tpu.memory_space<vmem>>, vector<8x256xf32>
    tpu.vector_store %arg13[%c64, %c0_166], %272 {strides = array<i32>} : memref<72x512xf32, #tpu.memory_space<vmem>>, vector<8x256xf32>,
    %274 = vector.extract_strided_slice %182 {offsets = [0, 256], sizes = [8, 256], strides = [1, 1]} : vector<8x512xf32> to vector<8x256xf32>
    %c0_167 = arith.constant 0 : index
    %c1_168 = arith.constant 1 : index
    %275 = vector.load %arg2[%c0_167, %c1_168] : memref<8x2xf32, #tpu.memory_space<vmem>>, vector<8x1xf32>
    %276 = vector.broadcast %275 : vector<8x1xf32> to vector<8x256xf32>
    %277 = arith.addf %274, %276 : vector<8x256xf32>
    %cst_169 = arith.constant 1.000000e+00 : f32
    %278 = vector.broadcast %cst_169 : f32 to vector<256x1xf32>
    %cst_170 = arith.constant dense<0.000000e+00> : vector<8x1xf32>
    %279 = tpu.matmul %277, %278, %cst_170 {dimension_numbers = #tpu.dot_dimension_numbers<[1], [0], [0], [1], [0, 0, 1, 1], [], []>} : vector<8x256xf32>, vector<256x1xf32>, vector<8x1xf32> -> vector<8x1xf32>
    %280 = arith.mulf %277, %277 : vector<8x256xf32>
    %cst_171 = arith.constant dense<0.000000e+00> : vector<8x1xf32>
    %281 = tpu.matmul %280, %278, %cst_171 {dimension_numbers = #tpu.dot_dimension_numbers<[1], [0], [0], [1], [0, 0, 1, 1], [], []>} : vector<8x256xf32>, vector<256x1xf32>, vector<8x1xf32> -> vector<8x1xf32>
    %282 = vector.shape_cast %279 : vector<8x1xf32> to vector<1x8x1xf32>
    %cst_172 = arith.constant dense<0.000000e+00> : vector<1xf32>
    %283 = vector.multi_reduction <add>, %282, %cst_172 [1, 2] : vector<1x8x1xf32> to vector<1xf32>
    %284 = vector.shape_cast %283 : vector<1xf32> to vector<1x1x1xf32>
    %285 = vector.extract %284[0, 0, 0] : f32 from vector<1x1x1xf32>
    %286 = vector.broadcast %285 : f32 to vector<1x1xf32>
    %cst_173 = arith.constant 2.048000e+03 : f32
    %287 = vector.broadcast %cst_173 : f32 to vector<1x1xf32>
    %288 = arith.divf %286, %287 : vector<1x1xf32>
    %289 = vector.shape_cast %281 : vector<8x1xf32> to vector<1x8x1xf32>
    %cst_174 = arith.constant dense<0.000000e+00> : vector<1xf32>
    %290 = vector.multi_reduction <add>, %289, %cst_174 [1, 2] : vector<1x8x1xf32> to vector<1xf32>
    %291 = vector.shape_cast %290 : vector<1xf32> to vector<1x1x1xf32>
    %292 = vector.extract %291[0, 0, 0] : f32 from vector<1x1x1xf32>
    %293 = vector.broadcast %292 : f32 to vector<1x1xf32>
    %cst_175 = arith.constant 2.048000e+03 : f32
    %294 = vector.broadcast %cst_175 : f32 to vector<1x1xf32>
    %295 = arith.divf %293, %294 : vector<1x1xf32>
    %296 = arith.mulf %288, %288 : vector<1x1xf32>
    %297 = arith.subf %295, %296 : vector<1x1xf32>
    %cst_176 = arith.constant 9.99999974E-6 : f32
    %298 = vector.broadcast %cst_176 : f32 to vector<1x1xf32>
    %299 = arith.addf %297, %298 : vector<1x1xf32>
    %300 = math.rsqrt %299 : vector<1x1xf32>
    %301 = vector.broadcast %300 : vector<1x1xf32> to vector<8x1xf32>
    %302 = arith.mulf %301, %2 : vector<8x1xf32>
    %303 = vector.broadcast %288 : vector<1x1xf32> to vector<8x1xf32>
    %304 = arith.mulf %303, %302 : vector<8x1xf32>
    %305 = arith.subf %3, %304 : vector<8x1xf32>
    %306 = vector.broadcast %302 : vector<8x1xf32> to vector<8x256xf32>
    %307 = arith.mulf %277, %306 : vector<8x256xf32>
    %308 = vector.broadcast %305 : vector<8x1xf32> to vector<8x256xf32>
    %309 = arith.addf %307, %308 : vector<8x256xf32>
    %310 = arith.negf %309 : vector<8x256xf32>
    %311 = math.exp %310 : vector<8x256xf32>
    %cst_177 = arith.constant 1.000000e+00 : f32
    %312 = vector.broadcast %cst_177 : f32 to vector<8x256xf32>
    %313 = arith.addf %312, %311 : vector<8x256xf32>
    %314 = arith.divf %312, %313 : vector<8x256xf32>
    %315 = arith.mulf %309, %314 : vector<8x256xf32>
    %c17_i32_178 = arith.constant 17 : i32
    %316 = tpu.dynamic_rotate %315 by %c17_i32_178 dim 1 : vector<8x256xf32>, i32 -> vector<8x256xf32>
    %c0_179 = arith.constant 0 : index
    %c0_180 = arith.constant 0 : index
    %c0_181 = arith.constant 0 : index
    %317 = vector.load %arg10[%c0_179, %c0_180, %c0_181] : memref<9x1x256xf32, #tpu.memory_space<vmem>>, vector<1x1x256xf32>
    %318 = vector.shape_cast %317 : vector<1x1x256xf32> to vector<1x256xf32>
    %319 = vector.broadcast %318 : vector<1x256xf32> to vector<8x256xf32>
    %320 = arith.mulf %316, %319 : vector<8x256xf32>
    %c0_182 = arith.constant 0 : index
    %c256_183 = arith.constant 256 : index
    %321 = vector.load %arg13[%c0_182, %c256_183] : memref<72x512xf32, #tpu.memory_space<vmem>>, vector<8x256xf32>
    tpu.vector_store %arg13[%c0_182, %c256_183], %320 {strides = array<i32>} : memref<72x512xf32, #tpu.memory_space<vmem>>, vector<8x256xf32>,
    %c16_i32_184 = arith.constant 16 : i32
    %322 = tpu.dynamic_rotate %315 by %c16_i32_184 dim 1 : vector<8x256xf32>, i32 -> vector<8x256xf32>
    %c1_185 = arith.constant 1 : index
    %c0_186 = arith.constant 0 : index
    %c0_187 = arith.constant 0 : index
    %323 = vector.load %arg10[%c1_185, %c0_186, %c0_187] : memref<9x1x256xf32, #tpu.memory_space<vmem>>, vector<1x1x256xf32>
    %324 = vector.shape_cast %323 : vector<1x1x256xf32> to vector<1x256xf32>
    %325 = vector.broadcast %324 : vector<1x256xf32> to vector<8x256xf32>
    %326 = arith.mulf %322, %325 : vector<8x256xf32>
    %c8_188 = arith.constant 8 : index
    %c256_189 = arith.constant 256 : index
    %327 = vector.load %arg13[%c8_188, %c256_189] : memref<72x512xf32, #tpu.memory_space<vmem>>, vector<8x256xf32>
    tpu.vector_store %arg13[%c8_188, %c256_189], %326 {strides = array<i32>} : memref<72x512xf32, #tpu.memory_space<vmem>>, vector<8x256xf32>,
    %c15_i32_190 = arith.constant 15 : i32
    %328 = tpu.dynamic_rotate %315 by %c15_i32_190 dim 1 : vector<8x256xf32>, i32 -> vector<8x256xf32>
    %c2_191 = arith.constant 2 : index
    %c0_192 = arith.constant 0 : index
    %c0_193 = arith.constant 0 : index
    %329 = vector.load %arg10[%c2_191, %c0_192, %c0_193] : memref<9x1x256xf32, #tpu.memory_space<vmem>>, vector<1x1x256xf32>
    %330 = vector.shape_cast %329 : vector<1x1x256xf32> to vector<1x256xf32>
    %331 = vector.broadcast %330 : vector<1x256xf32> to vector<8x256xf32>
    %332 = arith.mulf %328, %331 : vector<8x256xf32>
    %c16_194 = arith.constant 16 : index
    %c256_195 = arith.constant 256 : index
    %333 = vector.load %arg13[%c16_194, %c256_195] : memref<72x512xf32, #tpu.memory_space<vmem>>, vector<8x256xf32>
    tpu.vector_store %arg13[%c16_194, %c256_195], %332 {strides = array<i32>} : memref<72x512xf32, #tpu.memory_space<vmem>>, vector<8x256xf32>,
    %c1_i32_196 = arith.constant 1 : i32
    %334 = tpu.dynamic_rotate %315 by %c1_i32_196 dim 1 : vector<8x256xf32>, i32 -> vector<8x256xf32>
    %c3_197 = arith.constant 3 : index
    %c0_198 = arith.constant 0 : index
    %c0_199 = arith.constant 0 : index
    %335 = vector.load %arg10[%c3_197, %c0_198, %c0_199] : memref<9x1x256xf32, #tpu.memory_space<vmem>>, vector<1x1x256xf32>
    %336 = vector.shape_cast %335 : vector<1x1x256xf32> to vector<1x256xf32>
    %337 = vector.broadcast %336 : vector<1x256xf32> to vector<8x256xf32>
    %338 = arith.mulf %334, %337 : vector<8x256xf32>
    %c24_200 = arith.constant 24 : index
    %c256_201 = arith.constant 256 : index
    %339 = vector.load %arg13[%c24_200, %c256_201] : memref<72x512xf32, #tpu.memory_space<vmem>>, vector<8x256xf32>
    tpu.vector_store %arg13[%c24_200, %c256_201], %338 {strides = array<i32>} : memref<72x512xf32, #tpu.memory_space<vmem>>, vector<8x256xf32>,
    %c32_202 = arith.constant 32 : index
    %c256_203 = arith.constant 256 : index
    %340 = vector.load %arg13[%c32_202, %c256_203] : memref<72x512xf32, #tpu.memory_space<vmem>>, vector<8x256xf32>
    tpu.vector_store %arg13[%c32_202, %c256_203], %315 {strides = array<i32>} : memref<72x512xf32, #tpu.memory_space<vmem>>, vector<8x256xf32>,
    %c255_i32_204 = arith.constant 255 : i32
    %341 = tpu.dynamic_rotate %315 by %c255_i32_204 dim 1 : vector<8x256xf32>, i32 -> vector<8x256xf32>
    %c5_205 = arith.constant 5 : index
    %c0_206 = arith.constant 0 : index
    %c0_207 = arith.constant 0 : index
    %342 = vector.load %arg10[%c5_205, %c0_206, %c0_207] : memref<9x1x256xf32, #tpu.memory_space<vmem>>, vector<1x1x256xf32>
    %343 = vector.shape_cast %342 : vector<1x1x256xf32> to vector<1x256xf32>
    %344 = vector.broadcast %343 : vector<1x256xf32> to vector<8x256xf32>
    %345 = arith.mulf %341, %344 : vector<8x256xf32>
    %c40_208 = arith.constant 40 : index
    %c256_209 = arith.constant 256 : index
    %346 = vector.load %arg13[%c40_208, %c256_209] : memref<72x512xf32, #tpu.memory_space<vmem>>, vector<8x256xf32>
    tpu.vector_store %arg13[%c40_208, %c256_209], %345 {strides = array<i32>} : memref<72x512xf32, #tpu.memory_space<vmem>>, vector<8x256xf32>,
    %c241_i32_210 = arith.constant 241 : i32
    %347 = tpu.dynamic_rotate %315 by %c241_i32_210 dim 1 : vector<8x256xf32>, i32 -> vector<8x256xf32>
    %c6_211 = arith.constant 6 : index
    %c0_212 = arith.constant 0 : index
    %c0_213 = arith.constant 0 : index
    %348 = vector.load %arg10[%c6_211, %c0_212, %c0_213] : memref<9x1x256xf32, #tpu.memory_space<vmem>>, vector<1x1x256xf32>
    %349 = vector.shape_cast %348 : vector<1x1x256xf32> to vector<1x256xf32>
    %350 = vector.broadcast %349 : vector<1x256xf32> to vector<8x256xf32>
    %351 = arith.mulf %347, %350 : vector<8x256xf32>
    %c48_214 = arith.constant 48 : index
    %c256_215 = arith.constant 256 : index
    %352 = vector.load %arg13[%c48_214, %c256_215] : memref<72x512xf32, #tpu.memory_space<vmem>>, vector<8x256xf32>
    tpu.vector_store %arg13[%c48_214, %c256_215], %351 {strides = array<i32>} : memref<72x512xf32, #tpu.memory_space<vmem>>, vector<8x256xf32>,
    %c240_i32_216 = arith.constant 240 : i32
    %353 = tpu.dynamic_rotate %315 by %c240_i32_216 dim 1 : vector<8x256xf32>, i32 -> vector<8x256xf32>
    %c7_217 = arith.constant 7 : index
    %c0_218 = arith.constant 0 : index
    %c0_219 = arith.constant 0 : index
    %354 = vector.load %arg10[%c7_217, %c0_218, %c0_219] : memref<9x1x256xf32, #tpu.memory_space<vmem>>, vector<1x1x256xf32>
    %355 = vector.shape_cast %354 : vector<1x1x256xf32> to vector<1x256xf32>
    %356 = vector.broadcast %355 : vector<1x256xf32> to vector<8x256xf32>
    %357 = arith.mulf %353, %356 : vector<8x256xf32>
    %c56_220 = arith.constant 56 : index
    %c256_221 = arith.constant 256 : index
    %358 = vector.load %arg13[%c56_220, %c256_221] : memref<72x512xf32, #tpu.memory_space<vmem>>, vector<8x256xf32>
    tpu.vector_store %arg13[%c56_220, %c256_221], %357 {strides = array<i32>} : memref<72x512xf32, #tpu.memory_space<vmem>>, vector<8x256xf32>,
    %c239_i32_222 = arith.constant 239 : i32
    %359 = tpu.dynamic_rotate %315 by %c239_i32_222 dim 1 : vector<8x256xf32>, i32 -> vector<8x256xf32>
    %c8_223 = arith.constant 8 : index
    %c0_224 = arith.constant 0 : index
    %c0_225 = arith.constant 0 : index
    %360 = vector.load %arg10[%c8_223, %c0_224, %c0_225] : memref<9x1x256xf32, #tpu.memory_space<vmem>>, vector<1x1x256xf32>
    %361 = vector.shape_cast %360 : vector<1x1x256xf32> to vector<1x256xf32>
    %362 = vector.broadcast %361 : vector<1x256xf32> to vector<8x256xf32>
    %363 = arith.mulf %359, %362 : vector<8x256xf32>
    %c64_226 = arith.constant 64 : index
    %c256_227 = arith.constant 256 : index
    %364 = vector.load %arg13[%c64_226, %c256_227] : memref<72x512xf32, #tpu.memory_space<vmem>>, vector<8x256xf32>
    tpu.vector_store %arg13[%c64_226, %c256_227], %363 {strides = array<i32>} : memref<72x512xf32, #tpu.memory_space<vmem>>, vector<8x256xf32>,
    %c0_228 = arith.constant 0 : index
    %c0_229 = arith.constant 0 : index
    %365 = vector.load %arg8[%c0_228, %c0_229] : memref<8x72xf32, #tpu.memory_space<vmem>>, vector<8x72xf32>
    %c0_230 = arith.constant 0 : index
    %c0_231 = arith.constant 0 : index
    %366 = vector.load %arg13[%c0_230, %c0_231] : memref<72x512xf32, #tpu.memory_space<vmem>>, vector<72x512xf32>
    %cst_232 = arith.constant dense<0.000000e+00> : vector<8x512xf32>
    %367 = tpu.matmul %365, %366, %cst_232 {dimension_numbers = #tpu.dot_dimension_numbers<[1], [0], [0], [1], [0, 0, 1, 1], [], []>} : vector<8x72xf32>, vector<72x512xf32>, vector<8x512xf32> -> vector<8x512xf32>
    %c0_233 = arith.constant 0 : index
    %c0_234 = arith.constant 0 : index
    %368 = vector.load %arg9[%c0_233, %c0_234] : memref<8x1xf32, #tpu.memory_space<vmem>>, vector<8x1xf32>
    %369 = vector.broadcast %368 : vector<8x1xf32> to vector<8x512xf32>
    %370 = arith.addf %367, %369 : vector<8x512xf32>
    %c0_235 = arith.constant 0 : index
    %c0_236 = arith.constant 0 : index
    %371 = vector.load %arg1[%c0_235, %c0_236] : memref<4x512xf32, #tpu.memory_space<vmem>>, vector<4x512xf32>
    %c0_237 = arith.constant 0 : index
    %c0_238 = arith.constant 0 : index
    %372 = vector.load %arg11[%c0_237, %c0_238] : memref<8x4xf32, #tpu.memory_space<vmem>>, vector<8x4xf32>
    %cst_239 = arith.constant dense<0.000000e+00> : vector<8x512xf32>
    %373 = tpu.matmul %372, %371, %cst_239 {dimension_numbers = #tpu.dot_dimension_numbers<[1], [0], [0], [1], [0, 0, 1, 1], [], []>} : vector<8x4xf32>, vector<4x512xf32>, vector<8x512xf32> -> vector<8x512xf32>
    %374 = arith.addf %370, %373 : vector<8x512xf32>
    %c0_240 = arith.constant 0 : index
    %c0_241 = arith.constant 0 : index
    %375 = vector.load %arg12[%c0_240, %c0_241] : memref<8x512xf32, #tpu.memory_space<vmem>>, vector<8x512xf32>
    tpu.vector_store %arg12[%c0_240, %c0_241], %374 {strides = array<i32>} : memref<8x512xf32, #tpu.memory_space<vmem>>, vector<8x512xf32>,
    return
  }
  func.func @transform_0(%arg0: i32) -> (i32, i32) {
    %c0_i32 = arith.constant 0 : i32
    %c0_i32_0 = arith.constant 0 : i32
    %c0_i32_1 = arith.constant 0 : i32
    return %c0_i32, %c0_i32_0 : i32, i32
  }
  func.func @transform_1(%arg0: i32) -> (i32, i32) {
    %c0_i32 = arith.constant 0 : i32
    %c0_i32_0 = arith.constant 0 : i32
    %c0_i32_1 = arith.constant 0 : i32
    return %c0_i32, %c0_i32_0 : i32, i32
  }
  func.func @transform_2(%arg0: i32) -> (i32, i32) {
    %c0_i32 = arith.constant 0 : i32
    %c0_i32_0 = arith.constant 0 : i32
    %c0_i32_1 = arith.constant 0 : i32
    return %c0_i32, %c0_i32_0 : i32, i32
  }
  func.func @transform_3(%arg0: i32) -> (i32, i32) {
    %c0_i32 = arith.constant 0 : i32
    %c0_i32_0 = arith.constant 0 : i32
    %c0_i32_1 = arith.constant 0 : i32
    return %c0_i32, %c0_i32_0 : i32, i32
  }
  func.func @transform_4(%arg0: i32) -> (i32, i32) {
    %c0_i32 = arith.constant 0 : i32
    %c0_i32_0 = arith.constant 0 : i32
    %c0_i32_1 = arith.constant 0 : i32
    return %c0_i32, %c0_i32_0 : i32, i32
  }
  func.func @transform_5(%arg0: i32) -> (i32, i32) {
    %c0_i32 = arith.constant 0 : i32
    %c0_i32_0 = arith.constant 0 : i32
    %c0_i32_1 = arith.constant 0 : i32
    return %c0_i32, %c0_i32_0 : i32, i32
  }
  func.func @transform_6(%arg0: i32) -> (i32, i32) {
    %c0_i32 = arith.constant 0 : i32
    %c0_i32_0 = arith.constant 0 : i32
    %c0_i32_1 = arith.constant 0 : i32
    return %c0_i32, %c0_i32_0 : i32, i32
  }
  func.func @transform_7(%arg0: i32) -> (i32, i32) {
    %c0_i32 = arith.constant 0 : i32
    %c0_i32_0 = arith.constant 0 : i32
    %c0_i32_1 = arith.constant 0 : i32
    return %c0_i32, %c0_i32_0 : i32, i32
  }
  func.func @transform_8(%arg0: i32) -> (i32, i32) {
    %c0_i32 = arith.constant 0 : i32
    %c0_i32_0 = arith.constant 0 : i32
    %c0_i32_1 = arith.constant 0 : i32
    return %c0_i32, %c0_i32_0 : i32, i32
  }
  func.func @transform_9(%arg0: i32) -> (i32, i32, i32) {
    %c0_i32 = arith.constant 0 : i32
    %c0_i32_0 = arith.constant 0 : i32
    %c0_i32_1 = arith.constant 0 : i32
    %c0_i32_2 = arith.constant 0 : i32
    return %c0_i32, %c0_i32_0, %c0_i32_1 : i32, i32, i32
  }
  func.func @transform_10(%arg0: i32) -> (i32, i32) {
    %c0_i32 = arith.constant 0 : i32
    %c0_i32_0 = arith.constant 0 : i32
    %c0_i32_1 = arith.constant 0 : i32
    return %c0_i32, %c0_i32_0 : i32, i32
  }
  func.func @transform_11(%arg0: i32) -> (i32, i32) {
    %c0_i32 = arith.constant 0 : i32
    %c0_i32_0 = arith.constant 0 : i32
    %c0_i32_1 = arith.constant 0 : i32
    return %c0_i32, %c0_i32_0 : i32, i32
  }
}

</mosaic_0001>

<bundles_post_ra>
// kernel: resnet_forward.1
= control target key start
LH: loop header
LB: loop body
LE: loop exit
PB: predicated region body
PF: predicated region fallthrough
CT: control target
= control target key end

     0   :  { %v2794_v0 = vmov 1.0|1.0   ;;  %vm190_vm0 = vcmask 3072   ;;  %v2795_v25 = vmov 0   ;;  %s2799_s29 = smov 1   ;;  %s2800_s30 = smov 15   ;;  %s3536_s0 = inlined_call_operand.vmem [shape: f32[4,512], index: 0, kind: input, shape index: {}]   ;;  %s3537_s2 = inlined_call_operand.vmem [shape: f32[4,1], index: 2, kind: input, shape index: {}]   ;;  %s3538_s3 = inlined_call_operand.vmem [shape: f32[4,1], index: 3, kind: input, shape index: {}]   ;;  %s3539_s1 = inlined_call_operand.vmem [shape: f32[8,2], index: 1, kind: input, shape index: {}]   ;;  %s3540_s9 = inlined_call_operand.vmem [shape: f32[9,1,256], index: 9, kind: input, shape index: {}]   ;;  %s3541_s4 = inlined_call_operand.vmem [shape: f32[8,36], index: 4, kind: input, shape index: {}]   ;;  %s3542_s5 = inlined_call_operand.vmem [shape: f32[8,1], index: 5, kind: input, shape index: {}]   ;;  %s3543_s6 = inlined_call_operand.vmem [shape: f32[8,1], index: 6, kind: input, shape index: {}]   ;;  %s3544_s8 = inlined_call_operand.vmem [shape: f32[8,1], index: 8, kind: input, shape index: {}]   ;;  %s3545_s7 = inlined_call_operand.vmem [shape: f32[8,72], index: 7, kind: input, shape index: {}]   ;;  %s3546_s10 = inlined_call_operand.vmem [shape: f32[8,4], index: 10, kind: input, shape index: {}]   ;;  %s3547_s11 = inlined_call_operand.vmem [shape: f32[8,512], index: 11, kind: output, shape index: {}]  }
   0x1   :  { %2541 = vmatprep.subr.bf16.mxu0 %v2794_v0  ;;  %2557 = vmatprep.subr.bf16.mxu1 %v2794_v0  ;;  %v2872_v1 = vld [vmem:[%s3536_s0] sm:$0xff]  ;;  %v2909_v5 = vld [vmem:[%s3536_s0 + $0x8] sm:$0xff]  ;;  %s2801_s12 = smov 127   ;;  %s2802_s13 = smov 112   ;;  %vm920_vm9 = vcmask 1043456   ;;  %vm916_vm10 = vcmask 293888  }
   0x2   :  { %2542 = vmatpush3.bf16.msra.mxu0 %v2794_v0  ;;  %2558 = vmatpush3.bf16.msra.mxu1 %v2794_v0  ;;  %v44_v2 = vcombine.high %v2872_v1, %v2872_v1  ;;  %v116_v3 = vmul.f32 %v2872_v1, %v2872_v1  ;;  %v552_v6 = vmul.f32 %v2909_v5, %v2909_v5  ;;  %v38_v61 = vld [vmem:[%s3537_s2] sm:$0xf]  ;;  %s2797_s2 = smov 16   ;;  %s2803_s14 = smov 113   ;;  %vm1225_vm11 = vcmask 7168  }
   0x3   :  { %2543 = vmatprep.subr.bf16.mxu0 %v2794_v0  ;;  %2559 = vmatprep.subr.bf16.mxu1 %v2794_v0  ;;  %v480_v7 = vcombine.high %v2909_v5, %v2909_v5  ;;  %s2804_s15 = smov 111   ;;  %vm1894_vm12 = vcmask 588800   ;;  %vm2047_vm13 = vcmask 31744  }
   0x4   :  { %110 = vmatprep.mubr.f32.mxu0 %v44_v2  ;;  %v118_v4 = vcombine.high %v116_v3, %v116_v3  ;;  %v554_v8 = vcombine.high %v552_v6, %v552_v6  ;;  %2754 = vset.pattern.permute.xlu0 %v2795_v25  ;;  %v39_v2 = vld [vmem:[%s3538_s3] sm:$0xf]  ;;  %s2798_s3 = smov 17  }
   0x5   :  { %2755 = vset.pattern.permute.xlu1 %v2795_v25 }
   0x6   :  { %2544 = vmatpush3.bf16.msra.mxu0 %v2794_v0  ;;  %2560 = vmatpush3.bf16.msra.mxu1 %v2794_v0 }
   0x7   :  { %2545 = vmatprep.subr.bf16.mxu0 %v2794_v0  ;;  %2561 = vmatprep.subr.bf16.mxu1 %v2794_v0 }
   0x8   :  { %184 = vmatprep.mubr.f32.mxu1 %v118_v4 }
   0xa   :  { %2546 = vmatpush3.bf16.msra.mxu0 %v2794_v0  ;;  %2562 = vmatpush3.bf16.msra.mxu1 %v2794_v0 }
   0xb   :  { %2547 = vmatprep.subr.bf16.mxu0 %v2794_v0  ;;  %2563 = vmatprep.subr.bf16.mxu1 %v2794_v0 }
   0xe   :  { %2548 = vmatpush3.bf16.msra.mxu0 %v2794_v0  ;;  %2564 = vmatpush3.bf16.msra.mxu1 %v2794_v0 }
   0xf   :  { %2549 = vmatprep.subr.bf16.mxu0 %v2794_v0  ;;  %2565 = vmatprep.subr.bf16.mxu1 %v2794_v0 }
  0x12   :  { %2550 = vmatpush3.bf16.msra.mxu0 %v2794_v0  ;;  %2566 = vmatpush3.bf16.msra.mxu1 %v2794_v0 }
  0x13   :  { %2551 = vmatprep.subr.bf16.mxu0 %v2794_v0  ;;  %2567 = vmatprep.subr.bf16.mxu1 %v2794_v0 }
  0x16   :  { %2552 = vmatpush3.bf16.msra.mxu0 %v2794_v0  ;;  %2568 = vmatpush3.bf16.msra.mxu1 %v2794_v0 }
  0x17   :  { %2553 = vmatprep.subr.bf16.mxu0 %v2794_v0  ;;  %2569 = vmatprep.subr.bf16.mxu1 %v2794_v0 }
  0x1a   :  { %2554 = vmatpush3.bf16.msra.mxu0 %v2794_v0  ;;  %2570 = vmatpush3.bf16.msra.mxu1 %v2794_v0 }
  0x1b   :  { %2555 = vmatprep.subr.bf16.mxu0 %v2794_v0  ;;  %2571 = vmatprep.subr.bf16.mxu1 %v2794_v0 }
  0x1e   :  { %2556 = vmatpush3.bf16.msra.mxu0 %v2794_v0  ;;  %2572 = vmatpush3.bf16.msra.mxu1 %v2794_v0 }
  0x1f   :  { %2573 = vmatprep.subr.bf16.mxu0 %v2794_v0  ;;  %2589 = vmatprep.subr.bf16.mxu1 %v2794_v0 }
  0x21   :  { %111 = vmatmul.mubr.f32.vlgmr.msra.gmra.mrb[0].mxu0 %v2872_v1  ;;  %185 = vmatmul.mubr.f32.vlgmr.msra.gmra.mrb[0].mxu1 %v116_v3 }
  0x22   :  { %2574 = vmatpush3.bf16.msra.mxu0 %v2794_v0  ;;  %2590 = vmatpush3.bf16.msra.mxu1 %v2794_v0 }
  0x23   :  { %2575 = vmatprep.subr.bf16.mxu0 %v2794_v0  ;;  %2591 = vmatprep.subr.bf16.mxu1 %v2794_v0 }
  0x24   :  { %546 = vmatprep.mubr.f32.mxu0 %v480_v7  ;;  %620 = vmatprep.mubr.f32.mxu1 %v554_v8 }
  0x26   :  { %2576 = vmatpush3.bf16.msra.mxu0 %v2794_v0  ;;  %2592 = vmatpush3.bf16.msra.mxu1 %v2794_v0 }
  0x27   :  { %2577 = vmatprep.subr.bf16.mxu0 %v2794_v0  ;;  %2593 = vmatprep.subr.bf16.mxu1 %v2794_v0 }
  0x2a   :  { %2578 = vmatpush3.bf16.msra.mxu0 %v2794_v0  ;;  %2594 = vmatpush3.bf16.msra.mxu1 %v2794_v0 }
  0x2b   :  { %2579 = vmatprep.subr.bf16.mxu0 %v2794_v0  ;;  %2595 = vmatprep.subr.bf16.mxu1 %v2794_v0 }
  0x2e   :  { %2580 = vmatpush3.bf16.msra.mxu0 %v2794_v0  ;;  %2596 = vmatpush3.bf16.msra.mxu1 %v2794_v0 }
  0x2f   :  { %2581 = vmatprep.subr.bf16.mxu0 %v2794_v0  ;;  %2597 = vmatprep.subr.bf16.mxu1 %v2794_v0 }
  0x32   :  { %2582 = vmatpush3.bf16.msra.mxu0 %v2794_v0  ;;  %2598 = vmatpush3.bf16.msra.mxu1 %v2794_v0 }
  0x33   :  { %2583 = vmatprep.subr.bf16.mxu0 %v2794_v0  ;;  %2599 = vmatprep.subr.bf16.mxu1 %v2794_v0 }
  0x36   :  { %2584 = vmatpush3.bf16.msra.mxu0 %v2794_v0  ;;  %2600 = vmatpush3.bf16.msra.mxu1 %v2794_v0 }
  0x37   :  { %2585 = vmatprep.subr.bf16.mxu0 %v2794_v0  ;;  %2601 = vmatprep.subr.bf16.mxu1 %v2794_v0 }
  0x3a   :  { %2586 = vmatpush3.bf16.msra.mxu0 %v2794_v0  ;;  %2602 = vmatpush3.bf16.msra.mxu1 %v2794_v0 }
  0x3b   :  { %2587 = vmatprep.subr.bf16.mxu0 %v2794_v0  ;;  %2603 = vmatprep.subr.bf16.mxu1 %v2794_v0 }
  0x3e   :  { %2588 = vmatpush3.bf16.msra.mxu0 %v2794_v0  ;;  %2604 = vmatpush3.bf16.msra.mxu1 %v2794_v0 }
  0x41   :  { %547 = vmatmul.mubr.f32.vlgmr.msra.gmra.mrb[2].mxu0 %v2909_v5  ;;  %621 = vmatmul.mubr.f32.vlgmr.msra.gmra.mrb[2].mxu1 %v552_v6 }
  0xf4   :  { %v2293_v9 = vpop.f32.mrb[0].mxu0  ;;  %v2328_v10 = vpop.f32.mrb[0].mxu1 }
  0xf5   :  { %v2294_v11 = vpop.f32.mrb[1].mxu0  ;;  %v2329_v12 = vpop.f32.mrb[1].mxu1 }
  0xf6   :  { %v2295_v13 = vadd.f32 %v2294_v11, %v2293_v9  ;;  %v2330_v14 = vadd.f32 %v2329_v12, %v2328_v10 }
  0xf8   :  { %v191_v15 = vsel %vm190_vm0, %v2295_v13, 0.0  ;;  %v204_v16 = vsel %vm190_vm0, %v2330_v14, 0.0 }
  0xf9   :  { %192 = vadd.xlane.f32.xlu0 %v191_v15 }
  0xfd   :  { %205 = vadd.xlane.f32.xlu0 %v204_v16 }
 0x114   :  { %v2363_v17 = vpop.f32.mrb[2].mxu0  ;;  %v2398_v18 = vpop.f32.mrb[2].mxu1 }
 0x115   :  { %v2364_v19 = vpop.f32.mrb[3].mxu0  ;;  %v2399_v20 = vpop.f32.mrb[3].mxu1 }
 0x116   :  { %v2365_v21 = vadd.f32 %v2364_v19, %v2363_v17  ;;  %v2400_v22 = vadd.f32 %v2399_v20, %v2398_v18  ;;  %v2796_v17 = vmov 839922192   ;;  %v230_v19 = vlaneseq }
 0x117   :  { %v228_v18 = vunpack.c.l.s4 %v2796_v17 }
 0x118   :  { %v626_v23 = vsel %vm190_vm0, %v2365_v21, 0.0  ;;  %v638_v24 = vsel %vm190_vm0, %v2400_v22, 0.0  ;;  %v2960_v21 = vshrl.u32 %v230_v19, 7 }
 0x119   :  { %627 = vadd.xlane.f32.xlu1 %v626_v23  ;;  %v229_v20 = vunpack.c.0.s8 %v228_v18 }
 0x11b   :  { %v232_v22 = vsub.s32 %v229_v20, %v2960_v21 }
 0x11d   :  { %639 = vadd.xlane.f32.xlu1 %v638_v24 }
 0x186   :  { %v193_v26 = vpop.xlane.xlu0 %192 }
 0x187   :  { %v194_v27 = vrot.slane %v193_v26, 4 }
 0x189   :  { %v195_v28 = vadd.f32 %v194_v27, %v193_v26 }
 0x18a   :  { %v206_v29 = vpop.xlane.xlu0 %205 }
 0x18b   :  { %v196_v30 = vrot.slane %v195_v28, 2  ;;  %v207_v31 = vrot.slane %v206_v29, 4 }
 0x18d   :  { %v208_v32 = vadd.f32 %v207_v31, %v206_v29  ;;  %v197_v33 = vadd.f32 %v196_v30, %v195_v28 }
 0x18f   :  { %v209_v34 = vrot.slane %v208_v32, 2  ;;  %v198_v35 = vrot.slane %v197_v33, 1 }
 0x191   :  { %v199_v36 = vadd.f32 %v198_v35, %v197_v33  ;;  %v210_v37 = vadd.f32 %v209_v34, %v208_v32 }
 0x193   :  { %2725 = vpush %v199_v36  ;;  %v211_v38 = vrot.slane %v210_v37, 1 }
 0x195   :  { %v212_v39 = vadd.f32 %v211_v38, %v210_v37 }
 0x197   :  { %2727 = vpush %v212_v39 }
 0x1a6   :  { %v628_v40 = vpop.xlane.xlu1 %627 }
 0x1a7   :  { %v629_v41 = vrot.slane %v628_v40, 4 }
 0x1a9   :  { %v630_v42 = vadd.f32 %v629_v41, %v628_v40 }
 0x1aa   :  { %v640_v43 = vpop.xlane.xlu1 %639 }
 0x1ab   :  { %v631_v44 = vrot.slane %v630_v42, 2  ;;  %v641_v45 = vrot.slane %v640_v43, 4 }
 0x1ad   :  { %v642_v46 = vadd.f32 %v641_v45, %v640_v43  ;;  %v632_v47 = vadd.f32 %v631_v44, %v630_v42 }
 0x1af   :  { %v643_v48 = vrot.slane %v642_v46, 2  ;;  %v633_v49 = vrot.slane %v632_v47, 1 }
 0x1b1   :  { %v634_v50 = vadd.f32 %v633_v49, %v632_v47  ;;  %v644_v51 = vadd.f32 %v643_v48, %v642_v46  ;;  %v2805_v46 = vmov 0.0   ;;  %v1075_v47 = vld [vmem:[%s3539_s1] sm:$0xff]  ;;  %v2806_v48 = vmov 1  }
 0x1b2   :  { %997 = vmatprep.mubr.f32.mxu0 %v2805_v46  ;;  %1068 = vmatprep.mubr.f32.mxu1 %v2805_v46 }
 0x1b3   :  { %2729 = vpush %v634_v50  ;;  %v645_v52 = vrot.slane %v644_v51, 1  ;;  %v3004_v50 = vand.u32 127, %v230_v19 }
 0x1b5   :  { %v646_v53 = vadd.f32 %v645_v52, %v644_v51  ;;  %v3007_v51 = vsub.s32 0, %v2960_v21  ;;  %v3010_v52 = vsub.s32 1, %v2960_v21  ;;  %vm265_vm1 = vcmp.lt.s32.totalorder %v3004_v50, 17 }
 0x1b6   :  { %vm318_vm2 = vcmp.lt.s32.totalorder %v3004_v50, 15  ;;  %vm374_vm3 = vcmp.lt.s32.totalorder %v3004_v50, 127  ;;  %vm288_vm4 = vcmp.lt.s32.totalorder %v3004_v50, 16  ;;  %vm342_vm5 = vcmp.lt.s32.totalorder %v3004_v50, 1 }
 0x1b7   :  { %2731 = vpush %v646_v53  ;;  %vm428_vm6 = vcmp.lt.s32.totalorder %v3004_v50, 112  ;;  %vm404_vm7 = vcmp.lt.s32.totalorder %v3004_v50, 113  ;;  %vm458_vm8 = vcmp.lt.s32.totalorder %v3004_v50, 111  ;;  %v2042_v50 = vld [vmem:[%s3546_s10] sm:$0xff] }
 0x1c4   :  { %s2726_s21 = spop %2725 }
 0x1c5   :  { %v201_v54 = vstv %s2726_s21 }
 0x1c6   :  { %v203_v55 = vmul.f32 0.0009765625, %v201_v54  ;;  %v268_v54 = vld [vmem:[%s3540_s9] sm:$0x3] }
 0x1c8   :  { %s2728_s22 = spop %2727  ;;  %v216_v57 = vmul.f32 %v203_v55, %v203_v55 }
 0x1c9   :  { %v214_v56 = vstv %s2728_s22 }
 0x1ca   :  { %v215_v58 = vmul.f32 0.0009765625, %v214_v56 }
 0x1cc   :  { %v217_v59 = vsub.f32 %v215_v58, %v216_v57  ;;  %v277_v57 = vrot.slane %v268_v54, %v3010_v52  ;;  %v2215_v58 = vld [vmem:[%s3540_s9 + $0x4] sm:$0x3] }
 0x1ce   :  { %v218_v60 = vadd.f32 1e-05, %v217_v59 }
 0x1d0   :  { %2762 = vrsqrt.f32 %v218_v60 }
 0x1da   :  { %v2763_v62 = vpop.eup %2762 }
 0x1db   :  { %v220_v63 = vmul.f32 %v2763_v62, %v38_v61 }
 0x1dd   :  { %225 = vperm.xlu0 %2754, %v220_v63   ;;  %v221_v3 = vmul.f32 %v220_v63, %v203_v55 }
 0x1df   :  { %v222_v4 = vsub.f32 %v39_v2, %v221_v3  ;;  %v331_v3 = vrot.slane %v2215_v58, %v3010_v52 }
 0x1e1   :  { %238 = vperm.xlu1 %2755, %v222_v4   ;;  %2756 = vset.pattern.permute.xlu0 %v2806_v48  ;;  %v2217_v4 = vld [vmem:[%s3540_s9 + $0xa] sm:$0x3] }
 0x1e4   :  { %s2730_s27 = spop %2729 }
 0x1e5   :  { %v636_v6 = vstv %s2730_s27 }
 0x1e6   :  { %v637_v7 = vmul.f32 0.0009765625, %v636_v6 }
 0x1e8   :  { %v650_v8 = vmul.f32 %v637_v7, %v637_v7  ;;  %s2732_s28 = spop %2731 }
 0x1e9   :  { %v648_v9 = vstv %s2732_s28 }
 0x1ea   :  { %v649_v10 = vmul.f32 0.0009765625, %v648_v9 }
 0x1ec   :  { %v651_v11 = vsub.f32 %v649_v10, %v650_v8 }
 0x1ee   :  { %v652_v12 = vadd.f32 1e-05, %v651_v11 }
 0x1f0   :  { %2764 = vrsqrt.f32 %v652_v12  ;;  %v383_v12 = vrot.slane %v2217_v4, %v3007_v51 }
 0x1fa   :  { %v2765_v13 = vpop.eup %2764 }
 0x1fb   :  { %v654_v14 = vmul.f32 %v2765_v13, %v38_v61  ;;  %v387_v13 = vrot.slane %v2217_v4, %v3010_v52 }
 0x1fd   :  { %659 = vperm.xlu1 %2755, %v654_v14   ;;  %v655_v15 = vmul.f32 %v654_v14, %v637_v7  ;;  %v2214_v14 = vld [vmem:[%s3540_s9 + $0x2] sm:$0x3] }
 0x1fe   :  { %v297_v21 = vrot.slane %v2214_v14, %v3007_v51 }
 0x1ff   :  { %v656_v16 = vsub.f32 %v39_v2, %v655_v15  ;;  %v327_v2 = vrot.slane %v2215_v58, %v3007_v51 }
 0x201   :  { %672 = vperm.xlu1 %2755, %v656_v16  }
 0x25c   :  { %v226_v23 = vpop.permute.xlu0 %225 }
 0x25d   :  { %v233_v24 = vrot.slane %v226_v23, %v232_v22  ;;  %v2216_v23 = vld [vmem:[%s3540_s9 + $0x6] sm:$0x3] }
 0x25f   :  { %v235_v27 = vmul.f32 %v233_v24, %v2872_v1 }
 0x260   :  { %v239_v26 = vpop.permute.xlu1 %238 }
 0x261   :  { %v246_v28 = vrot.slane %v239_v26, %v232_v22 }
 0x263   :  { %v248_v29 = vadd.f32 %v246_v28, %v235_v27 }
 0x265   :  { %v2213_v30 = vmul.f32 -1.442695, %v248_v29 }
 0x267   :  { %2766 = vpow2.f32 %v2213_v30 }
 0x271   :  { %v2767_v31 = vpop.eup %2766 }
 0x272   :  { %v252_v32 = vadd.f32 1.0, %v2767_v31 }
 0x274   :  { %2768 = vrcp.f32 %v252_v32  ;;  %v351_v32 = vrot.slane %v2216_v23, %v3007_v51 }
 0x27c   :  { %v660_v33 = vpop.permute.xlu1 %659 }
 0x27d   :  { %v667_v34 = vrot.slane %v660_v33, %v232_v22  ;;  %v355_v33 = vrot.slane %v2216_v23, %v3010_v52 }
 0x27e   :  { %v2769_v35 = vpop.eup %2768 }
 0x27f   :  { %v255_v36 = vmul.f32 %v2769_v35, %v248_v29  ;;  %v669_v38 = vmul.f32 %v667_v34, %v2909_v5  ;;  %v2219_v34 = vld [vmem:[%s3540_s9 + $0xe] sm:$0x3] }
 0x280   :  { %v673_v37 = vpop.permute.xlu1 %672 }
 0x281   :  { %368 = vst [vmem:[#allocation2 + $0x40] sm:$0xf] %v255_v36  ;;  %v680_v39 = vrot.slane %v673_v37, %v232_v22  ;;  %284 = vrot.lane.b32.xlu1 %v255_v36, %s2797_s2  ;;  %v257_v1 = vcombine.high %v255_v36, %v255_v36  ;;  %v301_v22 = vrot.slane %v2214_v14, %v3010_v52 }
 0x283   :  { %v682_v40 = vadd.f32 %v680_v39, %v669_v38  ;;  %261 = vrot.lane.b32.xlu0 %v257_v1, %s2798_s3  ;;  %369 = vst [vmem:[#allocation2 + $0x48] sm:$0xf] %v257_v1 }
 0x285   :  { %v2221_v41 = vmul.f32 -1.442695, %v682_v40  ;;  %338 = vrot.lane.b32.xlu1 %v255_v36, %s2799_s29 }
 0x287   :  { %2770 = vpow2.f32 %v2221_v41  ;;  %316 = vrot.lane.b32.xlu0 %v257_v1, %s2800_s30 }
 0x289   :  { %259 = vrot.lane.b32.xlu1 %v255_v36, %s2798_s3 }
 0x28b   :  { %372 = vrot.lane.b32.xlu0 %v257_v1, %s2801_s12 }
 0x28d   :  { %314 = vrot.lane.b32.xlu1 %v255_v36, %s2800_s30 }
 0x28f   :  { %426 = vrot.lane.b32.xlu0 %v257_v1, %s2802_s13 }
 0x291   :  { %v2771_v5 = vpop.eup %2770  ;;  %370 = vrot.lane.b32.xlu1 %v255_v36, %s2801_s12 }
 0x292   :  { %v686_v42 = vadd.f32 1.0, %v2771_v5  ;;  %v437_v5 = vrot.slane %v2219_v34, %v3007_v51 }
 0x293   :  { %402 = vrot.lane.b32.xlu0 %v257_v1, %s2803_s14 }
 0x294   :  { %2772 = vrcp.f32 %v686_v42  ;;  %v441_v42 = vrot.slane %v2219_v34, %v3010_v52 }
 0x295   :  { %286 = vrot.lane.b32.xlu1 %v257_v1, %s2797_s2 }
 0x297   :  { %456 = vrot.lane.b32.xlu0 %v257_v1, %s2804_s15 }
 0x299   :  { %340 = vrot.lane.b32.xlu1 %v257_v1, %s2799_s29 }
 0x29d   :  { %424 = vrot.lane.b32.xlu1 %v255_v36, %s2802_s13 }
 0x29e   :  { %v2773_v43 = vpop.eup %2772 }
 0x29f   :  { %v689_v44 = vmul.f32 %v2773_v43, %v682_v40  ;;  %v2218_v43 = vld [vmem:[%s3540_s9 + $0xc] sm:$0x3] }
 0x2a1   :  { %793 = vst [vmem:[#allocation2 + $0x50] sm:$0xf] %v689_v44  ;;  %400 = vrot.lane.b32.xlu1 %v255_v36, %s2803_s14  ;;  %v691_v45 = vcombine.high %v689_v44, %v689_v44 }
 0x2a3   :  { %717 = vrot.lane.b32.xlu0 %v691_v45, %s2797_s2  ;;  %794 = vst [vmem:[#allocation2 + $0x58] sm:$0xf] %v691_v45 }
 0x2a5   :  { %454 = vrot.lane.b32.xlu1 %v255_v36, %s2804_s15 }
 0x2a7   :  { %767 = vrot.lane.b32.xlu0 %v691_v45, %s2799_s29 }
 0x2a9   :  { %715 = vrot.lane.b32.xlu1 %v689_v44, %s2797_s2 }
 0x2ab   :  { %695 = vrot.lane.b32.xlu0 %v691_v45, %s2798_s3 }
 0x2ad   :  { %765 = vrot.lane.b32.xlu1 %v689_v44, %s2799_s29 }
 0x2af   :  { %745 = vrot.lane.b32.xlu0 %v691_v45, %s2800_s30 }
 0x2b1   :  { %693 = vrot.lane.b32.xlu1 %v689_v44, %s2798_s3 }
 0x2b3   :  { %797 = vrot.lane.b32.xlu0 %v691_v45, %s2801_s12 }
 0x2b5   :  { %743 = vrot.lane.b32.xlu1 %v689_v44, %s2800_s30 }
 0x2b7   :  { %847 = vrot.lane.b32.xlu0 %v691_v45, %s2802_s13 }
 0x2b9   :  { %795 = vrot.lane.b32.xlu1 %v689_v44, %s2801_s12 }
 0x2bb   :  { %825 = vrot.lane.b32.xlu0 %v691_v45, %s2803_s14 }
 0x2bd   :  { %845 = vrot.lane.b32.xlu1 %v689_v44, %s2802_s13 }
 0x2bf   :  { %875 = vrot.lane.b32.xlu0 %v691_v45, %s2804_s15 }
 0x2c1   :  { %823 = vrot.lane.b32.xlu1 %v689_v44, %s2803_s14 }
 0x2c3   :  { %1467 = vperm.xlu0 %2756, %v1075_v47  }
 0x2c5   :  { %873 = vrot.lane.b32.xlu1 %v689_v44, %s2804_s15 }
 0x2c7   :  { %2757 = vset.pattern.permute.xlu0 %v2795_v25  ;;  %v273_v25 = vrot.slane %v268_v54, %v3007_v51 }
 0x2c9   :  { %1078 = vperm.xlu1 %2755, %v1075_v47  }
 0x2f3   :  { %v285_v49 = vpop.permute.xlu1 %284 }
 0x2f5   :  { %v262_v53 = vpop.permute.xlu0 %261 }
 0x2f7   :  { %v339_v55 = vpop.permute.xlu1 %338 }
 0x2f9   :  { %v317_v56 = vpop.permute.xlu0 %316 }
 0x2fb   :  { %v260_v59 = vpop.permute.xlu1 %259 }
 0x2fc   :  { %v266_v60 = vsel %vm265_vm1, %v260_v59, %v262_v53  ;;  %v267_v61 = vsel %vm265_vm1, %v262_v53, %v260_v59 }
 0x2fd   :  { %v280_v62 = vmul.f32 %v273_v25, %v267_v61  ;;  %v281_v63 = vmul.f32 %v277_v57, %v266_v60  ;;  %v373_v6 = vpop.permute.xlu0 %372  ;;  %v417_v25 = vrot.slane %v2218_v43, %v3010_v52  ;;  %v2220_v57 = vld [vmem:[%s3540_s9 + $0x10] sm:$0x3] }
 0x2fe   :  { %v467_v4 = vrot.slane %v2220_v57, %v3007_v51 }
 0x2ff   :  { %282 = vst [vmem:[#allocation2] sm:$0xf] %v280_v62  ;;  %283 = vst [vmem:[#allocation2 + $0x8] sm:$0xf] %v281_v63  ;;  %v315_v7 = vpop.permute.xlu1 %314 }
 0x300   :  { %v319_v8 = vsel %vm318_vm2, %v315_v7, %v317_v56  ;;  %v320_v9 = vsel %vm318_vm2, %v317_v56, %v315_v7  ;;  %v413_v56 = vrot.slane %v2218_v43, %v3007_v51  ;;  %v2222_v7 = vld [vmem:[%s3540_s9 + $0x2] sm:$0x3] }
 0x301   :  { %v334_v10 = vmul.f32 %v327_v2, %v320_v9  ;;  %v335_v11 = vmul.f32 %v331_v3, %v319_v8  ;;  %v427_v18 = vpop.permute.xlu0 %426  ;;  %v730_v14 = vrot.slane %v2222_v7, %v3010_v52 }
 0x303   :  { %336 = vst [vmem:[#allocation2 + $0x20] sm:$0xf] %v334_v10  ;;  %337 = vst [vmem:[#allocation2 + $0x28] sm:$0xf] %v335_v11  ;;  %v371_v15 = vpop.permute.xlu1 %370 }
 0x304   :  { %v375_v16 = vsel %vm374_vm3, %v371_v15, %v373_v6  ;;  %v376_v17 = vsel %vm374_vm3, %v373_v6, %v371_v15  ;;  %v471_v6 = vrot.slane %v2220_v57, %v3010_v52  ;;  %v3126_v57 = vld [vmem:[%s3541_s4] sm:$0xff] }
 0x305   :  { %v390_v19 = vmul.f32 %v383_v12, %v375_v16  ;;  %v391_v20 = vmul.f32 %v387_v13, %v376_v17  ;;  %v403_v35 = vpop.permute.xlu0 %402  ;;  %v726_v13 = vrot.slane %v2222_v7, %v3007_v51 }
 0x307   :  { %v394_v24 = vrot.slane %v390_v19, 4  ;;  %v395_v26 = vrot.slane %v391_v20, 4  ;;  %v287_v27 = vpop.permute.xlu1 %286 }
 0x308   :  { %v289_v28 = vsel %vm288_vm4, %v285_v49, %v287_v27  ;;  %v290_v29 = vsel %vm288_vm4, %v287_v27, %v285_v49 }
 0x309   :  { %398 = vst [vmem:[#allocation2 + $0x40] sm:$0xf0] %v394_v24  ;;  %399 = vst [vmem:[#allocation2 + $0x48] sm:$0xf0] %v395_v26  ;;  %v304_v30 = vmul.f32 %v297_v21, %v290_v29  ;;  %v305_v31 = vmul.f32 %v301_v22, %v289_v28  ;;  %v457_v53 = vpop.permute.xlu0 %456  ;;  %v2224_v22 = vld [vmem:[%s3540_s9 + $0x6] sm:$0x3] }
 0x30b   :  { %v308_v36 = vrot.slane %v304_v30, 4  ;;  %v309_v37 = vrot.slane %v305_v31, 4  ;;  %v341_v38 = vpop.permute.xlu1 %340  ;;  %v776_v30 = vrot.slane %v2224_v22, %v3007_v51  ;;  %v780_v31 = vrot.slane %v2224_v22, %v3010_v52 }
 0x30c   :  { %v343_v39 = vsel %vm342_vm5, %v339_v55, %v341_v38  ;;  %v344_v1 = vsel %vm342_vm5, %v341_v38, %v339_v55 }
 0x30d   :  { %312 = vst [vmem:[#allocation2] sm:$0xf0] %v308_v36  ;;  %313 = vst [vmem:[#allocation2 + $0x8] sm:$0xf0] %v309_v37  ;;  %v358_v40 = vmul.f32 %v351_v32, %v344_v1  ;;  %v359_v41 = vmul.f32 %v355_v33, %v343_v39  ;;  %v699_v33 = vld [vmem:[%s3540_s9] sm:$0x3] }
 0x30f   :  { %v362_v44 = vrot.slane %v358_v40, 4  ;;  %v363_v45 = vrot.slane %v359_v41, 4  ;;  %v425_v47 = vpop.permute.xlu1 %424 }
 0x310   :  { %v429_v48 = vsel %vm428_vm6, %v425_v47, %v427_v18  ;;  %v430_v49 = vsel %vm428_vm6, %v427_v18, %v425_v47  ;;  %v905_v32 = vld [vmem:[#allocation2 + $0x48] sm:$0xff]  ;;  %v708_v47 = vrot.slane %v699_v33, %v3010_v52 }
 0x311   :  { %366 = vst [vmem:[#allocation2 + $0x20] sm:$0xf0] %v362_v44  ;;  %367 = vst [vmem:[#allocation2 + $0x28] sm:$0xf0] %v363_v45  ;;  %v444_v54 = vmul.f32 %v437_v5, %v429_v48  ;;  %v445_v55 = vmul.f32 %v441_v42, %v430_v49  ;;  %v704_v45 = vrot.slane %v699_v33, %v3007_v51  ;;  %v2223_v49 = vld [vmem:[%s3540_s9 + $0x4] sm:$0x3] }
 0x312   :  { %v2228_v33 = vld [vmem:[%s3540_s9 + $0x10] sm:$0x3] }
 0x313   :  { %v448_v58 = vrot.slane %v444_v54, 4  ;;  %v449_v59 = vrot.slane %v445_v55, 4  ;;  %v401_v60 = vpop.permute.xlu1 %400 }
 0x314   :  { %v405_v61 = vsel %vm404_vm7, %v401_v60, %v403_v35  ;;  %v406_v62 = vsel %vm404_vm7, %v403_v35, %v401_v60  ;;  %v897_v9 = vld [vmem:[#allocation2 + $0x8] sm:$0xff]  ;;  %v896_v15 = vld [vmem:[#allocation2] sm:$0xff] }
 0x315   :  { %452 = vst [vmem:[#allocation2 + $0x60] sm:$0xf0] %v448_v58  ;;  %453 = vst [vmem:[#allocation2 + $0x68] sm:$0xf0] %v449_v59  ;;  %v420_v63 = vmul.f32 %v413_v56, %v405_v61  ;;  %v421_v2 = vmul.f32 %v417_v25, %v406_v62  ;;  %v718_v3 = vpop.permute.xlu0 %717  ;;  %v904_v35 = vld [vmem:[#allocation2 + $0x40] sm:$0xff]  ;;  %v754_v62 = vrot.slane %v2223_v49, %v3007_v51 }
 0x317   :  { %422 = vst [vmem:[#allocation2 + $0x60] sm:$0xf] %v420_v63  ;;  %423 = vst [vmem:[#allocation2 + $0x68] sm:$0xf] %v421_v2  ;;  %v455_v8 = vpop.permute.xlu1 %454  ;;  %v758_v63 = vrot.slane %v2223_v49, %v3010_v52  ;;  %v2225_v2 = vld [vmem:[%s3540_s9 + $0xa] sm:$0x3] }
 0x318   :  { %v459_v10 = vsel %vm458_vm8, %v455_v8, %v457_v53  ;;  %v460_v11 = vsel %vm458_vm8, %v457_v53, %v455_v8  ;;  %v901_v12 = vld [vmem:[#allocation2 + $0x28] sm:$0xff]  ;;  %v900_v16 = vld [vmem:[#allocation2 + $0x20] sm:$0xff] }
 0x319   :  { %v474_v17 = vmul.f32 %v467_v4, %v459_v10  ;;  %v475_v18 = vmul.f32 %v471_v6, %v460_v11  ;;  %v768_v19 = vpop.permute.xlu0 %767  ;;  %v2605_v20 = vpack.c.bf16 %v901_v12, %v897_v9  ;;  %v2607_v21 = vpack.c.bf16 %v900_v16, %v896_v15  ;;  %v2227_v11 = vld [vmem:[%s3540_s9 + $0xe] sm:$0x3] }
 0x31a   :  { %v806_v9 = vrot.slane %v2225_v2, %v3007_v51  ;;  %v810_v10 = vrot.slane %v2225_v2, %v3010_v52 }
 0x31b   :  { %476 = vst [vmem:[#allocation2 + $0x80] sm:$0xf] %v474_v17  ;;  %477 = vst [vmem:[#allocation2 + $0x88] sm:$0xf] %v475_v18  ;;  %2606 = vmatprep.subr.bf16.mxu0 %v2605_v20  ;;  %v716_v23 = vpop.permute.xlu1 %715  ;;  %v856_v18 = vrot.slane %v2227_v11, %v3007_v51  ;;  %v2226_v20 = vld [vmem:[%s3540_s9 + $0xc] sm:$0x3] }
 0x31c   :  { %v719_v24 = vsel %vm288_vm4, %v716_v23, %v718_v3  ;;  %v720_v26 = vsel %vm288_vm4, %v718_v3, %v716_v23  ;;  %2608 = vmatpush1.bf16.msra.mxu0 %v2607_v21 }
 0x31d   :  { %v733_v27 = vmul.f32 %v726_v13, %v720_v26  ;;  %v734_v28 = vmul.f32 %v730_v14, %v719_v24  ;;  %v696_v29 = vpop.permute.xlu0 %695 }
 0x31e   :  { %v909_v34 = vld [vmem:[#allocation2 + $0x68] sm:$0xff]  ;;  %v908_v36 = vld [vmem:[#allocation2 + $0x60] sm:$0xff] }
 0x31f   :  { %v737_v37 = vrot.slane %v733_v27, 4  ;;  %v738_v38 = vrot.slane %v734_v28, 4  ;;  %v766_v39 = vpop.permute.xlu1 %765  ;;  %v2609_v1 = vpack.c.bf16 %v909_v34, %v905_v32  ;;  %v2611_v40 = vpack.c.bf16 %v908_v36, %v904_v35 }
 0x320   :  { %v769_v41 = vsel %vm342_vm5, %v766_v39, %v768_v19  ;;  %v770_v5 = vsel %vm342_vm5, %v768_v19, %v766_v39  ;;  %v860_v19 = vrot.slane %v2227_v11, %v3010_v52 }
 0x321   :  { %741 = vst [vmem:[#allocation2 + $0x10] sm:$0xf0] %v737_v37  ;;  %742 = vst [vmem:[#allocation2 + $0x18] sm:$0xf0] %v738_v38  ;;  %v783_v42 = vmul.f32 %v776_v30, %v770_v5  ;;  %v784_v43 = vmul.f32 %v780_v31, %v769_v41  ;;  %v746_v44 = vpop.permute.xlu0 %745  ;;  %2610 = vmatprep.subr.bf16.mxu0 %v2609_v1  ;;  %v834_v30 = vrot.slane %v2226_v20, %v3007_v51 }
 0x322   :  { %2612 = vmatpush1.bf16.msra.mxu0 %v2611_v40  ;;  %v913_v48 = vld [vmem:[#allocation2 + $0x88] sm:$0xf]  ;;  %v912_v61 = vld [vmem:[#allocation2 + $0x80] sm:$0xf]  ;;  %v838_v31 = vrot.slane %v2226_v20, %v3010_v52 }
 0x323   :  { %v787_v53 = vrot.slane %v783_v42, 4  ;;  %v788_v54 = vrot.slane %v784_v43, 4  ;;  %2229 = vmatprep.subr.msk.mxu0 %vm920_vm9, %v913_v48  ;;  %v694_v55 = vpop.permute.xlu1 %693  ;;  %v884_v42 = vrot.slane %v2228_v33, %v3007_v51 }
 0x324   :  { %v697_v56 = vsel %vm265_vm1, %v694_v55, %v696_v29  ;;  %v698_v25 = vsel %vm265_vm1, %v696_v29, %v694_v55 }
 0x325   :  { %791 = vst [vmem:[#allocation2 + $0x30] sm:$0xf0] %v787_v53  ;;  %792 = vst [vmem:[#allocation2 + $0x38] sm:$0xf0] %v788_v54  ;;  %v711_v58 = vmul.f32 %v704_v45, %v698_v25  ;;  %v712_v59 = vmul.f32 %v708_v47, %v697_v56  ;;  %v798_v60 = vpop.permute.xlu0 %797  ;;  %v888_v45 = vrot.slane %v2228_v33, %v3010_v52 }
 0x326   :  { %2230 = vmatpush1.msk.msra.mxu0 %vm920_vm9, %v912_v61 }
 0x327   :  { %713 = vst [vmem:[#allocation2 + $0x10] sm:$0xf] %v711_v58  ;;  %714 = vst [vmem:[#allocation2 + $0x18] sm:$0xf] %v712_v59  ;;  %2231 = vmatmul.mubr.msk.f32.vlgmr.msra.gmra.mrb[4].mxu0 %vm916_vm10, %v3126_v57  ;;  %v744_v3 = vpop.permute.xlu1 %743  ;;  %2621 = vmatprep.subr.bf16.mxu0 %v2794_v0 }
 0x328   :  { %v747_v4 = vsel %vm318_vm2, %v744_v3, %v746_v44  ;;  %v748_v6 = vsel %vm318_vm2, %v746_v44, %v744_v3  ;;  %2622 = vmatpush3.bf16.msra.mxu0 %v2794_v0 }
 0x329   :  { %v761_v7 = vmul.f32 %v754_v62, %v748_v6  ;;  %v762_v8 = vmul.f32 %v758_v63, %v747_v4  ;;  %2623 = vmatprep.subr.bf16.mxu0 %v2794_v0  ;;  %v848_v12 = vpop.permute.xlu0 %847 }
 0x32b   :  { %763 = vst [vmem:[#allocation2 + $0x30] sm:$0xf] %v761_v7  ;;  %764 = vst [vmem:[#allocation2 + $0x38] sm:$0xf] %v762_v8  ;;  %v796_v13 = vpop.permute.xlu1 %795 }
 0x32c   :  { %v799_v14 = vsel %vm374_vm3, %v796_v13, %v798_v60  ;;  %v800_v15 = vsel %vm374_vm3, %v798_v60, %v796_v13  ;;  %2624 = vmatpush3.bf16.msra.mxu0 %v2794_v0 }
 0x32d   :  { %v813_v16 = vmul.f32 %v806_v9, %v799_v14  ;;  %v814_v17 = vmul.f32 %v810_v10, %v800_v15  ;;  %2625 = vmatprep.subr.bf16.mxu0 %v2794_v0  ;;  %v826_v27 = vpop.permute.xlu0 %825 }
 0x32e   :  { %v899_v32 = vld [vmem:[#allocation2 + $0x18] sm:$0xff]  ;;  %v898_v35 = vld [vmem:[#allocation2 + $0x10] sm:$0xff] }
 0x32f   :  { %v817_v21 = vrot.slane %v813_v16, 4  ;;  %v818_v22 = vrot.slane %v814_v17, 4  ;;  %v846_v23 = vpop.permute.xlu1 %845 }
 0x330   :  { %v849_v24 = vsel %vm428_vm6, %v846_v23, %v848_v12  ;;  %v850_v26 = vsel %vm428_vm6, %v848_v12, %v846_v23  ;;  %2626 = vmatpush3.bf16.msra.mxu0 %v2794_v0 }
 0x331   :  { %821 = vst [vmem:[#allocation2 + $0x50] sm:$0xf0] %v817_v21  ;;  %822 = vst [vmem:[#allocation2 + $0x58] sm:$0xf0] %v818_v22  ;;  %v863_v28 = vmul.f32 %v856_v18, %v849_v24  ;;  %v864_v29 = vmul.f32 %v860_v19, %v850_v26  ;;  %2627 = vmatprep.subr.bf16.mxu0 %v2794_v0  ;;  %v876_v47 = vpop.permute.xlu0 %875 }
 0x332   :  { %v903_v34 = vld [vmem:[#allocation2 + $0x38] sm:$0xff]  ;;  %v902_v36 = vld [vmem:[#allocation2 + $0x30] sm:$0xff] }
 0x333   :  { %v867_v37 = vrot.slane %v863_v28, 4  ;;  %v868_v38 = vrot.slane %v864_v29, 4  ;;  %v824_v39 = vpop.permute.xlu1 %823  ;;  %v2613_v1 = vpack.c.bf16 %v903_v34, %v899_v32  ;;  %v2615_v40 = vpack.c.bf16 %v902_v36, %v898_v35 }
 0x334   :  { %v827_v41 = vsel %vm404_vm7, %v824_v39, %v826_v27  ;;  %v828_v5 = vsel %vm404_vm7, %v826_v27, %v824_v39  ;;  %2628 = vmatpush3.bf16.msra.mxu0 %v2794_v0 }
 0x335   :  { %871 = vst [vmem:[#allocation2 + $0x70] sm:$0xf0] %v867_v37  ;;  %872 = vst [vmem:[#allocation2 + $0x78] sm:$0xf0] %v868_v38  ;;  %v841_v43 = vmul.f32 %v834_v30, %v827_v41  ;;  %v842_v44 = vmul.f32 %v838_v31, %v828_v5  ;;  %2614 = vmatprep.subr.bf16.mxu1 %v2613_v1  ;;  %2629 = vmatprep.subr.bf16.mxu0 %v2794_v0 }
 0x336   :  { %2616 = vmatpush1.bf16.msra.mxu1 %v2615_v40 }
 0x337   :  { %843 = vst [vmem:[#allocation2 + $0x70] sm:$0xf] %v841_v43  ;;  %844 = vst [vmem:[#allocation2 + $0x78] sm:$0xf] %v842_v44  ;;  %v874_v48 = vpop.permute.xlu1 %873 }
 0x338   :  { %v877_v49 = vsel %vm458_vm8, %v874_v48, %v876_v47  ;;  %v878_v53 = vsel %vm458_vm8, %v876_v47, %v874_v48  ;;  %2630 = vmatpush3.bf16.msra.mxu0 %v2794_v0  ;;  %v907_v56 = vld [vmem:[#allocation2 + $0x58] sm:$0xff]  ;;  %v906_v58 = vld [vmem:[#allocation2 + $0x50] sm:$0xff] }
 0x339   :  { %v891_v54 = vmul.f32 %v884_v42, %v877_v49  ;;  %v892_v55 = vmul.f32 %v888_v45, %v878_v53  ;;  %2631 = vmatprep.subr.bf16.mxu0 %v2794_v0 }
 0x33b   :  { %893 = vst [vmem:[#allocation2 + $0x90] sm:$0xf] %v891_v54  ;;  %894 = vst [vmem:[#allocation2 + $0x98] sm:$0xf] %v892_v55 }
 0x33c   :  { %2632 = vmatpush3.bf16.msra.mxu0 %v2794_v0 }
 0x33d   :  { %2633 = vmatprep.subr.bf16.mxu0 %v2794_v0 }
 0x33e   :  { %v911_v25 = vld [vmem:[#allocation2 + $0x78] sm:$0xff]  ;;  %v910_v59 = vld [vmem:[#allocation2 + $0x70] sm:$0xff] }
 0x33f   :  { %v2617_v60 = vpack.c.bf16 %v911_v25, %v907_v56  ;;  %v2619_v61 = vpack.c.bf16 %v910_v59, %v906_v58 }
 0x340   :  { %2634 = vmatpush3.bf16.msra.mxu0 %v2794_v0 }
 0x341   :  { %2618 = vmatprep.subr.bf16.mxu1 %v2617_v60  ;;  %2635 = vmatprep.subr.bf16.mxu0 %v2794_v0 }
 0x342   :  { %2620 = vmatpush1.bf16.msra.mxu1 %v2619_v61  ;;  %v915_v62 = vld [vmem:[#allocation2 + $0x98] sm:$0xf]  ;;  %v914_v63 = vld [vmem:[#allocation2 + $0x90] sm:$0xf]  ;;  %v1468_v9 = vpop.permute.xlu0 %1467 }
 0x343   :  { %2232 = vmatprep.subr.msk.mxu1 %vm920_vm9, %v915_v62 }
 0x344   :  { %2636 = vmatpush3.bf16.msra.mxu0 %v2794_v0 }
 0x345   :  { %2653 = vmatprep.subr.bf16.mxu0 %v2794_v0 }
 0x346   :  { %2233 = vmatpush1.msk.msra.mxu1 %vm920_vm9, %v914_v63 }
 0x347   :  { %2234 = vmatmul.mubr.msk.f32.vlgmr.msra.gmra.mrb[4].mxu1 %vm916_vm10, %v3126_v57  ;;  %2637 = vmatprep.subr.bf16.mxu1 %v2794_v0 }
 0x348   :  { %2638 = vmatpush3.bf16.msra.mxu1 %v2794_v0  ;;  %v1079_v57 = vpop.permute.xlu1 %1078 }
 0x349   :  { %2639 = vmatprep.subr.bf16.mxu1 %v2794_v0 }
 0x34c   :  { %2640 = vmatpush3.bf16.msra.mxu1 %v2794_v0 }
 0x34d   :  { %2641 = vmatprep.subr.bf16.mxu1 %v2794_v0 }
 0x350   :  { %2642 = vmatpush3.bf16.msra.mxu1 %v2794_v0 }
 0x351   :  { %2643 = vmatprep.subr.bf16.mxu1 %v2794_v0 }
 0x354   :  { %2644 = vmatpush3.bf16.msra.mxu1 %v2794_v0 }
 0x355   :  { %2645 = vmatprep.subr.bf16.mxu1 %v2794_v0 }
 0x358   :  { %2646 = vmatpush3.bf16.msra.mxu1 %v2794_v0 }
 0x359   :  { %2647 = vmatprep.subr.bf16.mxu1 %v2794_v0 }
 0x35c   :  { %2648 = vmatpush3.bf16.msra.mxu1 %v2794_v0 }
 0x35d   :  { %2649 = vmatprep.subr.bf16.mxu1 %v2794_v0 }
 0x360   :  { %2650 = vmatpush3.bf16.msra.mxu1 %v2794_v0 }
 0x361   :  { %2651 = vmatprep.subr.bf16.mxu1 %v2794_v0 }
 0x364   :  { %2652 = vmatpush3.bf16.msra.mxu1 %v2794_v0 }
 0x365   :  { %2669 = vmatprep.subr.bf16.mxu1 %v2794_v0 }
 0x3fa   :  { %v999_v2 = vpop.f32.mrb[4].mxu0 }
 0x3fb   :  { %v3211_v3 = vadd.f32 %v1079_v57, %v999_v2  ;;  %v1001_v4 = vpop.f32.mrb[5].mxu0 }
 0x3fc   :  { %v3213_v6 = vadd.f32 %v1079_v57, %v1001_v4 }
 0x3fd   :  { %v1153_v8 = vmul.f32 %v3211_v3, %v3211_v3 }
 0x3fe   :  { %1147 = vmatprep.mubr.f32.mxu0 %v3213_v6  ;;  %v1154_v7 = vmul.f32 %v3213_v6, %v3213_v6 }
 0x3ff   :  { %1148 = vmatmul.mubr.f32.vlgmr.msra.gmra.mrb[6].mxu0 %v3211_v3 }
 0x400   :  { %1219 = vmatprep.mubr.f32.mxu1 %v1154_v7  ;;  %2654 = vmatpush3.bf16.msra.mxu0 %v2794_v0 }
 0x401   :  { %1220 = vmatmul.mubr.f32.vlgmr.msra.gmra.mrb[6].mxu1 %v1153_v8  ;;  %2655 = vmatprep.subr.bf16.mxu0 %v2794_v0 }
 0x402   :  { %2670 = vmatpush3.bf16.msra.mxu1 %v2794_v0 }
 0x403   :  { %2671 = vmatprep.subr.bf16.mxu1 %v2794_v0 }
 0x404   :  { %2656 = vmatpush3.bf16.msra.mxu0 %v2794_v0 }
 0x405   :  { %2657 = vmatprep.subr.bf16.mxu0 %v2794_v0 }
 0x406   :  { %2672 = vmatpush3.bf16.msra.mxu1 %v2794_v0 }
 0x407   :  { %2673 = vmatprep.subr.bf16.mxu1 %v2794_v0 }
 0x408   :  { %2658 = vmatpush3.bf16.msra.mxu0 %v2794_v0 }
 0x409   :  { %2659 = vmatprep.subr.bf16.mxu0 %v2794_v0 }
 0x40a   :  { %2674 = vmatpush3.bf16.msra.mxu1 %v2794_v0 }
 0x40b   :  { %2675 = vmatprep.subr.bf16.mxu1 %v2794_v0 }
 0x40c   :  { %2660 = vmatpush3.bf16.msra.mxu0 %v2794_v0 }
 0x40d   :  { %2661 = vmatprep.subr.bf16.mxu0 %v2794_v0 }
 0x40e   :  { %2676 = vmatpush3.bf16.msra.mxu1 %v2794_v0 }
 0x40f   :  { %2677 = vmatprep.subr.bf16.mxu1 %v2794_v0 }
 0x410   :  { %2662 = vmatpush3.bf16.msra.mxu0 %v2794_v0 }
 0x411   :  { %2663 = vmatprep.subr.bf16.mxu0 %v2794_v0 }
 0x412   :  { %2678 = vmatpush3.bf16.msra.mxu1 %v2794_v0 }
 0x413   :  { %2679 = vmatprep.subr.bf16.mxu1 %v2794_v0 }
 0x414   :  { %2664 = vmatpush3.bf16.msra.mxu0 %v2794_v0 }
 0x415   :  { %2665 = vmatprep.subr.bf16.mxu0 %v2794_v0 }
 0x416   :  { %2680 = vmatpush3.bf16.msra.mxu1 %v2794_v0 }
 0x417   :  { %2681 = vmatprep.subr.bf16.mxu1 %v2794_v0 }
 0x418   :  { %2666 = vmatpush3.bf16.msra.mxu0 %v2794_v0 }
 0x419   :  { %2667 = vmatprep.subr.bf16.mxu0 %v2794_v0 }
 0x41a   :  { %v1070_v10 = vpop.f32.mrb[4].mxu1  ;;  %2682 = vmatpush3.bf16.msra.mxu1 %v2794_v0 }
 0x41b   :  { %v3248_v11 = vadd.f32 %v1468_v9, %v1070_v10  ;;  %v1072_v12 = vpop.f32.mrb[5].mxu1  ;;  %2683 = vmatprep.subr.bf16.mxu1 %v2794_v0 }
 0x41c   :  { %v3251_v13 = vadd.f32 %v1468_v9, %v1072_v12  ;;  %2668 = vmatpush3.bf16.msra.mxu0 %v2794_v0  ;;  %v40_v9 = vld [vmem:[%s3542_s5] sm:$0xff] }
 0x41d   :  { %v1542_v14 = vmul.f32 %v3248_v11, %v3248_v11 }
 0x41e   :  { %1536 = vmatprep.mubr.f32.mxu0 %v3251_v13  ;;  %2684 = vmatpush3.bf16.msra.mxu1 %v2794_v0  ;;  %v1543_v15 = vmul.f32 %v3251_v13, %v3251_v13 }
 0x41f   :  { %1537 = vmatmul.mubr.f32.vlgmr.msra.gmra.mrb[8].mxu0 %v3248_v11 }
 0x420   :  { %1608 = vmatprep.mubr.f32.mxu1 %v1543_v15  ;;  %1962 = vmatprep.mubr.f32.mxu0 %v2805_v46 }
 0x421   :  { %1609 = vmatmul.mubr.f32.vlgmr.msra.gmra.mrb[8].mxu1 %v1542_v14  ;;  %v41_v14 = vld [vmem:[%s3543_s6] sm:$0xff] }
 0x422   :  { %2033 = vmatprep.mubr.f32.mxu1 %v2805_v46 }
 0x4d2   :  { %v2433_v16 = vpop.f32.mrb[6].mxu0 }
 0x4d3   :  { %v2434_v17 = vpop.f32.mrb[7].mxu0 }
 0x4d4   :  { %v2435_v18 = vadd.f32 %v2434_v17, %v2433_v16  ;;  %v2468_v19 = vpop.f32.mrb[6].mxu1 }
 0x4d5   :  { %v2469_v20 = vpop.f32.mrb[7].mxu1 }
 0x4d6   :  { %v2470_v21 = vadd.f32 %v2469_v20, %v2468_v19  ;;  %v1226_v0 = vsel %vm1225_vm11, %v2435_v18, 0.0 }
 0x4d7   :  { %1227 = vadd.xlane.f32.xlu1 %v1226_v0 }
 0x4d8   :  { %v1239_v22 = vsel %vm1225_vm11, %v2470_v21, 0.0 }
 0x4d9   :  { %1240 = vadd.xlane.f32.xlu0 %v1239_v22 }
 0x4f2   :  { %v2503_v23 = vpop.f32.mrb[8].mxu0 }
 0x4f3   :  { %v2504_v24 = vpop.f32.mrb[9].mxu0 }
 0x4f4   :  { %v2505_v26 = vadd.f32 %v2504_v24, %v2503_v23  ;;  %v2538_v27 = vpop.f32.mrb[8].mxu1 }
 0x4f5   :  { %v2539_v28 = vpop.f32.mrb[9].mxu1 }
 0x4f6   :  { %v2540_v29 = vadd.f32 %v2539_v28, %v2538_v27  ;;  %v1614_v30 = vsel %vm1225_vm11, %v2505_v26, 0.0 }
 0x4f7   :  { %1615 = vadd.xlane.f32.xlu1 %v1614_v30 }
 0x4f8   :  { %v1626_v31 = vsel %vm1225_vm11, %v2540_v29, 0.0 }
 0x4f9   :  { %1627 = vadd.xlane.f32.xlu0 %v1626_v31 }
 0x564   :  { %v1228_v32 = vpop.xlane.xlu1 %1227 }
 0x565   :  { %v1229_v33 = vrot.slane %v1228_v32, 4 }
 0x566   :  { %v1241_v34 = vpop.xlane.xlu0 %1240 }
 0x567   :  { %v1230_v35 = vadd.f32 %v1229_v33, %v1228_v32  ;;  %v1242_v36 = vrot.slane %v1241_v34, 4 }
 0x569   :  { %v1231_v37 = vrot.slane %v1230_v35, 2  ;;  %v1243_v38 = vadd.f32 %v1242_v36, %v1241_v34 }
 0x56b   :  { %v1244_v39 = vrot.slane %v1243_v38, 2  ;;  %v1232_v1 = vadd.f32 %v1231_v37, %v1230_v35 }
 0x56d   :  { %v1233_v40 = vrot.slane %v1232_v1, 1  ;;  %v1245_v41 = vadd.f32 %v1244_v39, %v1243_v38 }
 0x56f   :  { %v1234_v5 = vadd.f32 %v1233_v40, %v1232_v1  ;;  %v1246_v42 = vrot.slane %v1245_v41, 1 }
 0x571   :  { %2733 = vpush %v1234_v5  ;;  %v1247_v43 = vadd.f32 %v1246_v42, %v1245_v41 }
 0x573   :  { %2735 = vpush %v1247_v43 }
 0x584   :  { %v1616_v44 = vpop.xlane.xlu1 %1615 }
 0x585   :  { %v1617_v45 = vrot.slane %v1616_v44, 4 }
 0x586   :  { %v1628_v47 = vpop.xlane.xlu0 %1627 }
 0x587   :  { %v1618_v48 = vadd.f32 %v1617_v45, %v1616_v44  ;;  %v1629_v49 = vrot.slane %v1628_v47, 4 }
 0x589   :  { %v1619_v53 = vrot.slane %v1618_v48, 2  ;;  %v1630_v54 = vadd.f32 %v1629_v49, %v1628_v47 }
 0x58b   :  { %v1631_v55 = vrot.slane %v1630_v54, 2  ;;  %v1620_v56 = vadd.f32 %v1619_v53, %v1618_v48 }
 0x58d   :  { %v1621_v25 = vrot.slane %v1620_v56, 1  ;;  %v1632_v58 = vadd.f32 %v1631_v55, %v1630_v54 }
 0x58f   :  { %v1622_v59 = vadd.f32 %v1621_v25, %v1620_v56  ;;  %v1633_v60 = vrot.slane %v1632_v58, 1 }
 0x591   :  { %2737 = vpush %v1622_v59  ;;  %v1634_v61 = vadd.f32 %v1633_v60, %v1632_v58  ;;  %v1888_v58 = vld [vmem:[%s3544_s8] sm:$0xff] }
 0x592   :  { %v1292_v59 = vld [vmem:[%s3540_s9] sm:$0x3] }
 0x593   :  { %2739 = vpush %v1634_v61  ;;  %v1297_v61 = vrot.slane %v1292_v59, %v3007_v51 }
 0x5a2   :  { %s2734_s22 = spop %2733 }
 0x5a3   :  { %v1236_v62 = vstv %s2734_s22 }
 0x5a4   :  { %v1238_v63 = vmul.f32 0.00048828125, %v1236_v62  ;;  %s2736_s23 = spop %2735  ;;  %v1301_v62 = vrot.slane %v1292_v59, %v3010_v52 }
 0x5a5   :  { %v1249_v57 = vstv %s2736_s23 }
 0x5a6   :  { %v1251_v2 = vmul.f32 %v1238_v63, %v1238_v63  ;;  %v1250_v4 = vmul.f32 0.00048828125, %v1249_v57 }
 0x5a8   :  { %v1252_v7 = vsub.f32 %v1250_v4, %v1251_v2 }
 0x5aa   :  { %v1253_v8 = vadd.f32 1e-05, %v1252_v7 }
 0x5ac   :  { %2774 = vrsqrt.f32 %v1253_v8 }
 0x5b6   :  { %v2775_v10 = vpop.eup %2774 }
 0x5b7   :  { %v1255_v12 = vmul.f32 %v2775_v10, %v40_v9 }
 0x5b9   :  { %1260 = vperm.xlu1 %2755, %v1255_v12   ;;  %v1256_v15 = vmul.f32 %v1255_v12, %v1238_v63 }
 0x5bb   :  { %v1257_v16 = vsub.f32 %v41_v14, %v1256_v15 }
 0x5bd   :  { %1267 = vperm.xlu1 %2755, %v1257_v16   ;;  %v2238_v16 = vld [vmem:[%s3540_s9 + $0x4] sm:$0x3] }
 0x5c2   :  { %s2738_s28 = spop %2737 }
 0x5c3   :  { %v1624_v17 = vstv %s2738_s28 }
 0x5c4   :  { %v1625_v18 = vmul.f32 0.00048828125, %v1624_v17  ;;  %s2740_s16 = spop %2739 }
 0x5c5   :  { %v1636_v19 = vstv %s2740_s16 }
 0x5c6   :  { %v1638_v20 = vmul.f32 %v1625_v18, %v1625_v18  ;;  %v1637_v21 = vmul.f32 0.00048828125, %v1636_v19 }
 0x5c8   :  { %v1639_v0 = vsub.f32 %v1637_v21, %v1638_v20 }
 0x5ca   :  { %v1640_v22 = vadd.f32 1e-05, %v1639_v0  ;;  %v1341_v0 = vrot.slane %v2238_v16, %v3007_v51 }
 0x5cc   :  { %2776 = vrsqrt.f32 %v1640_v22  ;;  %v1345_v22 = vrot.slane %v2238_v16, %v3010_v52 }
 0x5d6   :  { %v2777_v23 = vpop.eup %2776 }
 0x5d7   :  { %v1642_v24 = vmul.f32 %v2777_v23, %v40_v9  ;;  %v2237_v9 = vld [vmem:[%s3540_s9 + $0x2] sm:$0x3]  ;;  %v2239_v23 = vld [vmem:[%s3540_s9 + $0x6] sm:$0x3] }
 0x5d8   :  { %v1323_v15 = vrot.slane %v2237_v9, %v3010_v52 }
 0x5d9   :  { %1647 = vperm.xlu0 %2757, %v1642_v24   ;;  %v1643_v26 = vmul.f32 %v1642_v24, %v1625_v18 }
 0x5db   :  { %v1644_v27 = vsub.f32 %v41_v14, %v1643_v26  ;;  %v1319_v14 = vrot.slane %v2237_v9, %v3007_v51 }
 0x5dd   :  { %1654 = vperm.xlu1 %2755, %v1644_v27  }
 0x638   :  { %v1261_v28 = vpop.permute.xlu1 %1260 }
 0x639   :  { %v1263_v29 = vmul.f32 %v1261_v28, %v3211_v3  ;;  %v1264_v30 = vmul.f32 %v1261_v28, %v3213_v6 }
 0x63c   :  { %v1268_v31 = vpop.permute.xlu1 %1267 }
 0x63d   :  { %v1270_v32 = vadd.f32 %v1268_v31, %v1263_v29  ;;  %v1271_v33 = vadd.f32 %v1268_v31, %v1264_v30 }
 0x63f   :  { %v2235_v34 = vmul.f32 -1.442695, %v1270_v32  ;;  %v2236_v35 = vmul.f32 -1.442695, %v1271_v33 }
 0x641   :  { %2778 = vpow2.f32 %v2235_v34  ;;  %v1367_v34 = vrot.slane %v2239_v23, %v3010_v52 }
 0x642   :  { %2780 = vpow2.f32 %v2236_v35  ;;  %v2240_v35 = vld [vmem:[%s3540_s9 + $0xa] sm:$0x3] }
 0x64b   :  { %v2779_v36 = vpop.eup %2778 }
 0x64c   :  { %v2781_v37 = vpop.eup %2780  ;;  %v1278_v38 = vadd.f32 1.0, %v2779_v36 }
 0x64d   :  { %v1279_v39 = vadd.f32 1.0, %v2781_v37 }
 0x64e   :  { %2782 = vrcp.f32 %v1278_v38 }
 0x64f   :  { %2784 = vrcp.f32 %v1279_v39 }
 0x658   :  { %v2783_v1 = vpop.eup %2782  ;;  %v1648_v40 = vpop.permute.xlu0 %1647 }
 0x659   :  { %v2785_v41 = vpop.eup %2784  ;;  %v3275_v5 = vmul.f32 %v2783_v1, %v1270_v32  ;;  %v1650_v6 = vmul.f32 %v1648_v40, %v3248_v11  ;;  %v1651_v42 = vmul.f32 %v1648_v40, %v3251_v13 }
 0x65a   :  { %v3277_v3 = vmul.f32 %v2785_v41, %v1271_v33  ;;  %v1363_v33 = vrot.slane %v2239_v23, %v3007_v51  ;;  %v1387_v41 = vrot.slane %v2240_v35, %v3007_v51 }
 0x65b   :  { %1374 = vst [vmem:[#allocation2 + $0x80] sm:$0xff] %v3275_v5  ;;  %1330 = vrot.lane.b32.xlu0 %v3275_v5, %s2800_s30  ;;  %1286 = vrot.lane.b32.xlu1 %v3275_v5, %s2798_s3 }
 0x65c   :  { %1375 = vst [vmem:[#allocation2 + $0x88] sm:$0xff] %v3277_v3  ;;  %v1655_v43 = vpop.permute.xlu1 %1654 }
 0x65d   :  { %v1657_v44 = vadd.f32 %v1655_v43, %v1650_v6  ;;  %v1658_v45 = vadd.f32 %v1655_v43, %v1651_v42  ;;  %v1391_v6 = vrot.slane %v2240_v35, %v3010_v52  ;;  %v2241_v42 = vld [vmem:[%s3540_s9 + $0xc] sm:$0x3] }
 0x65f   :  { %v2244_v47 = vmul.f32 -1.442695, %v1657_v44  ;;  %v2245_v48 = vmul.f32 -1.442695, %v1658_v45  ;;  %1352 = vrot.lane.b32.xlu0 %v3275_v5, %s2799_s29  ;;  %1288 = vrot.lane.b32.xlu1 %v3277_v3, %s2798_s3 }
 0x661   :  { %2786 = vpow2.f32 %v2244_v47 }
 0x662   :  { %2788 = vpow2.f32 %v2245_v48 }
 0x663   :  { %1376 = vrot.lane.b32.xlu0 %v3275_v5, %s2801_s12  ;;  %1308 = vrot.lane.b32.xlu1 %v3275_v5, %s2797_s2 }
 0x667   :  { %1398 = vrot.lane.b32.xlu0 %v3275_v5, %s2803_s14  ;;  %1310 = vrot.lane.b32.xlu1 %v3277_v3, %s2797_s2 }
 0x66b   :  { %v2787_v11 = vpop.eup %2786  ;;  %1420 = vrot.lane.b32.xlu0 %v3275_v5, %s2802_s13  ;;  %1332 = vrot.lane.b32.xlu1 %v3277_v3, %s2800_s30 }
 0x66c   :  { %v2789_v13 = vpop.eup %2788  ;;  %v1665_v49 = vadd.f32 1.0, %v2787_v11 }
 0x66d   :  { %v1666_v53 = vadd.f32 1.0, %v2789_v13 }
 0x66e   :  { %2790 = vrcp.f32 %v1665_v49  ;;  %v1409_v49 = vrot.slane %v2241_v42, %v3007_v51 }
 0x66f   :  { %2792 = vrcp.f32 %v1666_v53  ;;  %1354 = vrot.lane.b32.xlu1 %v3277_v3, %s2799_s29  ;;  %v1413_v53 = vrot.slane %v2241_v42, %v3010_v52 }
 0x673   :  { %1378 = vrot.lane.b32.xlu1 %v3277_v3, %s2801_s12 }
 0x677   :  { %1400 = vrot.lane.b32.xlu1 %v3277_v3, %s2803_s14 }
 0x678   :  { %v2791_v54 = vpop.eup %2790 }
 0x679   :  { %v2793_v55 = vpop.eup %2792  ;;  %v3309_v56 = vmul.f32 %v2791_v54, %v1657_v44  ;;  %v2242_v54 = vld [vmem:[%s3540_s9 + $0xe] sm:$0x3] }
 0x67a   :  { %v3311_v25 = vmul.f32 %v2793_v55, %v1658_v45 }
 0x67b   :  { %1761 = vst [vmem:[#allocation2 + $0x90] sm:$0xff] %v3309_v56  ;;  %1422 = vrot.lane.b32.xlu1 %v3277_v3, %s2802_s13  ;;  %1695 = vrot.lane.b32.xlu0 %v3309_v56, %s2797_s2 }
 0x67c   :  { %1762 = vst [vmem:[#allocation2 + $0x98] sm:$0xff] %v3311_v25 }
 0x67f   :  { %1717 = vrot.lane.b32.xlu0 %v3309_v56, %s2800_s30  ;;  %1673 = vrot.lane.b32.xlu1 %v3309_v56, %s2798_s3 }
 0x683   :  { %1739 = vrot.lane.b32.xlu0 %v3309_v56, %s2799_s29  ;;  %1675 = vrot.lane.b32.xlu1 %v3311_v25, %s2798_s3 }
 0x687   :  { %1763 = vrot.lane.b32.xlu0 %v3309_v56, %s2801_s12  ;;  %1697 = vrot.lane.b32.xlu1 %v3311_v25, %s2797_s2 }
 0x68b   :  { %1785 = vrot.lane.b32.xlu0 %v3309_v56, %s2803_s14  ;;  %1719 = vrot.lane.b32.xlu1 %v3311_v25, %s2800_s30 }
 0x68f   :  { %1807 = vrot.lane.b32.xlu0 %v3309_v56, %s2802_s13  ;;  %1741 = vrot.lane.b32.xlu1 %v3311_v25, %s2799_s29 }
 0x693   :  { %1442 = vrot.lane.b32.xlu0 %v3275_v5, %s2804_s15  ;;  %1765 = vrot.lane.b32.xlu1 %v3311_v25, %s2801_s12 }
 0x697   :  { %1829 = vrot.lane.b32.xlu0 %v3309_v56, %s2804_s15  ;;  %1787 = vrot.lane.b32.xlu1 %v3311_v25, %s2803_s14 }
 0x69b   :  { %1891 = vperm.xlu0 %2757, %v1888_v58   ;;  %1809 = vrot.lane.b32.xlu1 %v3311_v25, %s2802_s13 }
 0x69f   :  { %1444 = vrot.lane.b32.xlu1 %v3277_v3, %s2804_s15 }
 0x6a3   :  { %1831 = vrot.lane.b32.xlu1 %v3311_v25, %s2804_s15 }
 0x6cd   :  { %v1287_v60 = vpop.permute.xlu1 %1286  ;;  %v1331_v63 = vpop.permute.xlu0 %1330 }
 0x6d1   :  { %v1289_v57 = vpop.permute.xlu1 %1288  ;;  %v1353_v12 = vpop.permute.xlu0 %1352 }
 0x6d2   :  { %v1290_v2 = vsel %vm265_vm1, %v1287_v60, %v1289_v57  ;;  %v1291_v4 = vsel %vm265_vm1, %v1289_v57, %v1287_v60 }
 0x6d3   :  { %v1304_v7 = vmul.f32 %v1297_v61, %v1291_v4  ;;  %v1305_v8 = vmul.f32 %v1301_v62, %v1290_v2  ;;  %v1431_v2 = vrot.slane %v2242_v54, %v3007_v51  ;;  %v1435_v4 = vrot.slane %v2242_v54, %v3010_v52 }
 0x6d5   :  { %1306 = vst [vmem:[#allocation2] sm:$0xff] %v1304_v7  ;;  %1307 = vst [vmem:[#allocation2 + $0x8] sm:$0xff] %v1305_v8  ;;  %v1309_v10 = vpop.permute.xlu1 %1308  ;;  %v1377_v24 = vpop.permute.xlu0 %1376 }
 0x6d9   :  { %v1311_v17 = vpop.permute.xlu1 %1310  ;;  %v1399_v39 = vpop.permute.xlu0 %1398 }
 0x6da   :  { %v1312_v18 = vsel %vm288_vm4, %v1309_v10, %v1311_v17  ;;  %v1313_v19 = vsel %vm288_vm4, %v1311_v17, %v1309_v10 }
 0x6db   :  { %v1326_v20 = vmul.f32 %v1319_v14, %v1313_v19  ;;  %v1327_v21 = vmul.f32 %v1323_v15, %v1312_v18 }
 0x6dd   :  { %1328 = vst [vmem:[#allocation2 + $0x20] sm:$0xff] %v1326_v20  ;;  %1329 = vst [vmem:[#allocation2 + $0x28] sm:$0xff] %v1327_v21  ;;  %v1333_v26 = vpop.permute.xlu1 %1332  ;;  %v2685_v27 = vpack.c.bf16 %v1327_v21, %v1305_v8  ;;  %v2687_v28 = vpack.c.bf16 %v1326_v20, %v1304_v7  ;;  %v1421_v55 = vpop.permute.xlu0 %1420  ;;  %v2246_v20 = vld [vmem:[%s3540_s9 + $0x2] sm:$0x3] }
 0x6de   :  { %v1334_v29 = vsel %vm318_vm2, %v1331_v63, %v1333_v26  ;;  %v1335_v30 = vsel %vm318_vm2, %v1333_v26, %v1331_v63 }
 0x6df   :  { %v1348_v31 = vmul.f32 %v1341_v0, %v1335_v30  ;;  %v1349_v32 = vmul.f32 %v1345_v22, %v1334_v29  ;;  %2686 = vmatprep.subr.bf16.mxu0 %v2685_v27  ;;  %v1706_v27 = vrot.slane %v2246_v20, %v3007_v51  ;;  %v2247_v29 = vld [vmem:[%s3540_s9 + $0x4] sm:$0x3] }
 0x6e0   :  { %2688 = vmatpush1.bf16.msra.mxu0 %v2687_v28  ;;  %v1710_v28 = vrot.slane %v2246_v20, %v3010_v52  ;;  %v1728_v35 = vrot.slane %v2247_v29, %v3007_v51  ;;  %v2243_v20 = vld [vmem:[%s3540_s9 + $0x10] sm:$0x3] }
 0x6e1   :  { %1350 = vst [vmem:[#allocation2 + $0x40] sm:$0xff] %v1348_v31  ;;  %1351 = vst [vmem:[#allocation2 + $0x48] sm:$0xff] %v1349_v32  ;;  %v1355_v36 = vpop.permute.xlu1 %1354 }
 0x6e2   :  { %v1356_v37 = vsel %vm342_vm5, %v1353_v12, %v1355_v36  ;;  %v1357_v38 = vsel %vm342_vm5, %v1355_v36, %v1353_v12  ;;  %v1679_v12 = vld [vmem:[%s3540_s9] sm:$0x3]  ;;  %v1732_v36 = vrot.slane %v2247_v29, %v3010_v52 }
 0x6e3   :  { %v1370_v1 = vmul.f32 %v1363_v33, %v1357_v38  ;;  %v1371_v40 = vmul.f32 %v1367_v34, %v1356_v37  ;;  %v1684_v18 = vrot.slane %v1679_v12, %v3007_v51  ;;  %v1688_v19 = vrot.slane %v1679_v12, %v3010_v52  ;;  %v2248_v37 = vld [vmem:[%s3540_s9 + $0x6] sm:$0x3] }
 0x6e5   :  { %1372 = vst [vmem:[#allocation2 + $0x60] sm:$0xff] %v1370_v1  ;;  %1373 = vst [vmem:[#allocation2 + $0x68] sm:$0xff] %v1371_v40  ;;  %v1379_v43 = vpop.permute.xlu1 %1378  ;;  %v2689_v44 = vpack.c.bf16 %v1371_v40, %v1349_v32  ;;  %v2691_v45 = vpack.c.bf16 %v1370_v1, %v1348_v31 }
 0x6e6   :  { %v1380_v47 = vsel %vm374_vm3, %v1377_v24, %v1379_v43  ;;  %v1381_v48 = vsel %vm374_vm3, %v1379_v43, %v1377_v24 }
 0x6e7   :  { %v1394_v11 = vmul.f32 %v1387_v41, %v1380_v47  ;;  %v1395_v13 = vmul.f32 %v1391_v6, %v1381_v48  ;;  %2690 = vmatprep.subr.bf16.mxu0 %v2689_v44  ;;  %v1750_v44 = vrot.slane %v2248_v37, %v3007_v51  ;;  %v2249_v47 = vld [vmem:[%s3540_s9 + $0xa] sm:$0x3] }
 0x6e8   :  { %2692 = vmatpush1.bf16.msra.mxu0 %v2691_v45  ;;  %v1754_v45 = vrot.slane %v2248_v37, %v3010_v52 }
 0x6e9   :  { %v1401_v58 = vpop.permute.xlu1 %1400  ;;  %v2693_v59 = vpack.c.bf16 %v1395_v13, %v3277_v3  ;;  %v2695_v60 = vpack.c.bf16 %v1394_v11, %v3275_v5 }
 0x6ea   :  { %v1402_v61 = vsel %vm404_vm7, %v1399_v39, %v1401_v58  ;;  %v1403_v62 = vsel %vm404_vm7, %v1401_v58, %v1399_v39  ;;  %v1778_v58 = vrot.slane %v2249_v47, %v3010_v52 }
 0x6eb   :  { %v1416_v63 = vmul.f32 %v1409_v49, %v1402_v61  ;;  %v1417_v57 = vmul.f32 %v1413_v53, %v1403_v62  ;;  %2694 = vmatprep.subr.bf16.mxu0 %v2693_v59  ;;  %v2250_v59 = vld [vmem:[%s3540_s9 + $0xc] sm:$0x3] }
 0x6ec   :  { %2696 = vmatpush1.bf16.msra.mxu0 %v2695_v60 }
 0x6ed   :  { %v1696_v7 = vpop.permute.xlu0 %1695  ;;  %v1423_v8 = vpop.permute.xlu1 %1422 }
 0x6ee   :  { %v1424_v3 = vsel %vm428_vm6, %v1421_v55, %v1423_v8  ;;  %v1425_v5 = vsel %vm428_vm6, %v1423_v8, %v1421_v55  ;;  %v1774_v55 = vrot.slane %v2249_v47, %v3007_v51  ;;  %v1800_v8 = vrot.slane %v2250_v59, %v3010_v52 }
 0x6ef   :  { %v1438_v9 = vmul.f32 %v1431_v2, %v1424_v3  ;;  %v1439_v10 = vmul.f32 %v1435_v4, %v1425_v5  ;;  %v2251_v3 = vld [vmem:[%s3540_s9 + $0xe] sm:$0x3] }
 0x6f1   :  { %v1718_v14 = vpop.permute.xlu0 %1717  ;;  %v1674_v15 = vpop.permute.xlu1 %1673  ;;  %v2697_v16 = vpack.c.bf16 %v1439_v10, %v1417_v57  ;;  %v2699_v17 = vpack.c.bf16 %v1438_v9, %v1416_v63 }
 0x6f3   :  { %2698 = vmatprep.subr.bf16.mxu0 %v2697_v16 }
 0x6f4   :  { %2700 = vmatpush1.bf16.msra.mxu0 %v2699_v17 }
 0x6f5   :  { %v1676_v21 = vpop.permute.xlu1 %1675  ;;  %v1740_v23 = vpop.permute.xlu0 %1739 }
 0x6f6   :  { %v1677_v0 = vsel %vm265_vm1, %v1674_v15, %v1676_v21  ;;  %v1678_v22 = vsel %vm265_vm1, %v1676_v21, %v1674_v15 }
 0x6f7   :  { %v1691_v24 = vmul.f32 %v1684_v18, %v1678_v22  ;;  %v1692_v26 = vmul.f32 %v1688_v19, %v1677_v0  ;;  %v1818_v18 = vrot.slane %v2251_v3, %v3007_v51  ;;  %v1822_v19 = vrot.slane %v2251_v3, %v3010_v52 }
 0x6f9   :  { %1693 = vst [vmem:[#allocation2 + $0x10] sm:$0xff] %v1691_v24  ;;  %1694 = vst [vmem:[#allocation2 + $0x18] sm:$0xff] %v1692_v26  ;;  %v1698_v30 = vpop.permute.xlu1 %1697  ;;  %v1764_v38 = vpop.permute.xlu0 %1763 }
 0x6fa   :  { %v1699_v31 = vsel %vm288_vm4, %v1696_v7, %v1698_v30  ;;  %v1700_v32 = vsel %vm288_vm4, %v1698_v30, %v1696_v7  ;;  %v1796_v7 = vrot.slane %v2250_v59, %v3007_v51 }
 0x6fb   :  { %v1713_v33 = vmul.f32 %v1706_v27, %v1700_v32  ;;  %v1714_v34 = vmul.f32 %v1710_v28, %v1699_v31  ;;  %v2252_v27 = vld [vmem:[%s3540_s9 + $0x10] sm:$0x3]  ;;  %v2040_v28 = vld [vmem:[%s3536_s0] sm:$0xff] }
 0x6fc   :  { %v1844_v37 = vrot.slane %v2252_v27, %v3010_v52 }
 0x6fd   :  { %1715 = vst [vmem:[#allocation2 + $0x30] sm:$0xff] %v1713_v33  ;;  %1716 = vst [vmem:[#allocation2 + $0x38] sm:$0xff] %v1714_v34  ;;  %v1720_v39 = vpop.permute.xlu1 %1719  ;;  %v2701_v1 = vpack.c.bf16 %v1714_v34, %v1692_v26  ;;  %v2703_v40 = vpack.c.bf16 %v1713_v33, %v1691_v24  ;;  %v1786_v49 = vpop.permute.xlu0 %1785  ;;  %v1453_v24 = vrot.slane %v2243_v20, %v3007_v51 }
 0x6fe   :  { %v1721_v41 = vsel %vm318_vm2, %v1718_v14, %v1720_v39  ;;  %v1722_v6 = vsel %vm318_vm2, %v1720_v39, %v1718_v14  ;;  %v1457_v26 = vrot.slane %v2243_v20, %v3010_v52  ;;  %v1840_v34 = vrot.slane %v2252_v27, %v3007_v51  ;;  %v1851_v39 = vld [vmem:[%s3545_s7] sm:$0xff] }
 0x6ff   :  { %v1735_v42 = vmul.f32 %v1728_v35, %v1722_v6  ;;  %v1736_v43 = vmul.f32 %v1732_v36, %v1721_v41  ;;  %2702 = vmatprep.subr.bf16.mxu1 %v2701_v1  ;;  %v2041_v1 = vld [vmem:[%s3536_s0 + $0x8] sm:$0xff] }
 0x700   :  { %2704 = vmatpush1.bf16.msra.mxu1 %v2703_v40 }
 0x701   :  { %1737 = vst [vmem:[#allocation2 + $0x50] sm:$0xff] %v1735_v42  ;;  %1738 = vst [vmem:[#allocation2 + $0x58] sm:$0xff] %v1736_v43  ;;  %v1742_v48 = vpop.permute.xlu1 %1741  ;;  %v1808_v5 = vpop.permute.xlu0 %1807 }
 0x702   :  { %v1743_v11 = vsel %vm342_vm5, %v1740_v23, %v1742_v48  ;;  %v1744_v13 = vsel %vm342_vm5, %v1742_v48, %v1740_v23 }
 0x703   :  { %v1757_v53 = vmul.f32 %v1750_v44, %v1744_v13  ;;  %v1758_v54 = vmul.f32 %v1754_v45, %v1743_v11 }
 0x705   :  { %1759 = vst [vmem:[#allocation2 + $0x70] sm:$0xff] %v1757_v53  ;;  %1760 = vst [vmem:[#allocation2 + $0x78] sm:$0xff] %v1758_v54  ;;  %v1766_v60 = vpop.permute.xlu1 %1765  ;;  %v2705_v61 = vpack.c.bf16 %v1758_v54, %v1736_v43  ;;  %v2707_v62 = vpack.c.bf16 %v1757_v53, %v1735_v42  ;;  %v1443_v0 = vpop.permute.xlu0 %1442  ;;  %v2046_v43 = vcombine.high %v2041_v1, %v2041_v1 }
 0x706   :  { %v1767_v63 = vsel %vm374_vm3, %v1764_v38, %v1766_v60  ;;  %v1768_v57 = vsel %vm374_vm3, %v1766_v60, %v1764_v38  ;;  %v2045_v38 = vcombine.high %v2040_v28, %v2040_v28 }
 0x707   :  { %v1781_v2 = vmul.f32 %v1774_v55, %v1767_v63  ;;  %v1782_v4 = vmul.f32 %v1778_v58, %v1768_v57  ;;  %2706 = vmatprep.subr.bf16.mxu1 %v2705_v61 }
 0x708   :  { %2708 = vmatpush1.bf16.msra.mxu1 %v2707_v62 }
 0x709   :  { %v1788_v9 = vpop.permute.xlu1 %1787  ;;  %v2709_v10 = vpack.c.bf16 %v1782_v4, %v3311_v25  ;;  %v2711_v12 = vpack.c.bf16 %v1781_v2, %v3309_v56  ;;  %v1830_v40 = vpop.permute.xlu0 %1829 }
 0x70a   :  { %v1789_v14 = vsel %vm404_vm7, %v1786_v49, %v1788_v9  ;;  %v1790_v15 = vsel %vm404_vm7, %v1788_v9, %v1786_v49 }
 0x70b   :  { %v1803_v16 = vmul.f32 %v1796_v7, %v1789_v14  ;;  %v1804_v17 = vmul.f32 %v1800_v8, %v1790_v15  ;;  %2710 = vmatprep.subr.bf16.mxu1 %v2709_v10 }
 0x70c   :  { %2712 = vmatpush1.bf16.msra.mxu1 %v2711_v12 }
 0x70d   :  { %v1810_v25 = vpop.permute.xlu1 %1809 }
 0x70e   :  { %v1811_v56 = vsel %vm428_vm6, %v1808_v5, %v1810_v25  ;;  %v1812_v21 = vsel %vm428_vm6, %v1810_v25, %v1808_v5 }
 0x70f   :  { %v1825_v22 = vmul.f32 %v1818_v18, %v1811_v56  ;;  %v1826_v23 = vmul.f32 %v1822_v19, %v1812_v21 }
 0x711   :  { %v1445_v29 = vpop.permute.xlu1 %1444  ;;  %v2713_v30 = vpack.c.bf16 %v1826_v23, %v1804_v17  ;;  %v2715_v31 = vpack.c.bf16 %v1825_v22, %v1803_v16 }
 0x712   :  { %v1446_v32 = vsel %vm458_vm8, %v1443_v0, %v1445_v29  ;;  %v1447_v33 = vsel %vm458_vm8, %v1445_v29, %v1443_v0 }
 0x713   :  { %v1460_v35 = vmul.f32 %v1453_v24, %v1446_v32  ;;  %v1461_v36 = vmul.f32 %v1457_v26, %v1447_v33  ;;  %2714 = vmatprep.subr.bf16.mxu1 %v2713_v30 }
 0x714   :  { %2716 = vmatpush1.bf16.msra.mxu1 %v2715_v31 }
 0x715   :  { %v1832_v41 = vpop.permute.xlu1 %1831  ;;  %1914 = vmatprep.subr.mxu0 %v1461_v36 }
 0x716   :  { %v1833_v51 = vsel %vm458_vm8, %v1830_v40, %v1832_v41  ;;  %v1834_v52 = vsel %vm458_vm8, %v1832_v41, %v1830_v40  ;;  %1915 = vmatpush1.msra.mxu0 %v1460_v35 }
 0x717   :  { %v1847_v6 = vmul.f32 %v1840_v34, %v1833_v51  ;;  %v1848_v42 = vmul.f32 %v1844_v37, %v1834_v52  ;;  %2253 = vmatmul.mubr.msk.f32.vlgmr.msra.gmra.mrb[10].mxu0 %vm1894_vm12, %v1851_v39  ;;  %2255 = vmatprep.subr.msk.mxu0 %vm920_vm9, %v2045_v38 }
 0x718   :  { %2256 = vmatpush1.msk.msra.mxu0 %vm920_vm9, %v2040_v28  ;;  %2123 = vmatprep.mubr.f32.mxu0 %v2805_v46 }
 0x719   :  { %1985 = vmatprep.subr.mxu1 %v1848_v42 }
 0x71a   :  { %1986 = vmatpush1.msra.mxu1 %v1847_v6  ;;  %v1892_v44 = vpop.permute.xlu0 %1891 }
 0x71b   :  { %2254 = vmatmul.mubr.msk.f32.vlgmr.msra.gmra.mrb[10].mxu1 %vm1894_vm12, %v1851_v39  ;;  %2258 = vmatprep.subr.msk.mxu1 %vm920_vm9, %v2046_v43 }
 0x71c   :  { %2259 = vmatpush1.msk.msra.mxu1 %vm920_vm9, %v2041_v1  ;;  %2194 = vmatprep.mubr.f32.mxu1 %v2805_v46 }
 0x71f   :  { %2257 = vmatmul.mubr.msk.f32.vlgmr.msra.gmra.mrb[10].mxu0 %vm2047_vm13, %v2042_v50 }
 0x723   :  { %2260 = vmatmul.mubr.msk.f32.vlgmr.msra.gmra.mrb[10].mxu1 %vm2047_vm13, %v2042_v50 }
 0x7f2   :  { %v2125_v45 = vpop.f32.mrb[10].mxu0 }
 0x7f3   :  { %v2717_v47 = vadd.f32 %v2125_v45, %v1892_v44  ;;  %v2127_v48 = vpop.f32.mrb[11].mxu0 }
 0x7f4   :  { %v2718_v11 = vadd.f32 %v2127_v48, %v1892_v44 }
 0x7f5   :  { %2205 = vst [vmem:[%s3547_s11] sm:$0xff] %v2717_v47 }
 0x7f6   :  { %2206 = vst [vmem:[%s3547_s11 + $0x8] sm:$0xff] %v2718_v11  ;;  %v2196_v13 = vpop.f32.mrb[10].mxu1 }
 0x7f7   :  { %v2719_v49 = vadd.f32 %v2196_v13, %v1892_v44  ;;  %v2198_v53 = vpop.f32.mrb[11].mxu1 }
 0x7f8   :  { %v2720_v54 = vadd.f32 %v2198_v53, %v1892_v44 }
 0x7f9   :  { %2207 = vst [vmem:[%s3547_s11 + $0x10] sm:$0xff] %v2719_v49 }
 0x7fa   :  { %2208 = vst [vmem:[%s3547_s11 + $0x18] sm:$0xff] %v2720_v54 }

</bundles_post_ra>
